<compile_context>
chip_gen: v7x
topology: tpu7x:2x2x1
jax: 0.10.0
libtpu: 0.0.40
codegen_flags: <defaults>
</compile_context>

<pallas_src>
import functools
import math

import jax
import jax.numpy as jnp
from jax.experimental import pallas as pl
from jax.experimental.pallas import tpu as pltpu


# ----------------------------------------------------------------------------
# generation-aware budgets
# ----------------------------------------------------------------------------
def _tpu_vmem_capacity_bytes():
    try:
        cap = getattr(pltpu.get_tpu_info(), "vmem_capacity_bytes", None)
        if cap:
            return int(cap)
    except Exception:
        pass
    return 64 * 1024 * 1024                       # conservative fallback (v7x per-core)


_VMEM_CAP = _tpu_vmem_capacity_bytes()
_VMEM_LIMIT = (_VMEM_CAP * 3) // 4                # 96 MiB on v5e/v6e, 48 MiB on v7x
_BIG_VMEM = _VMEM_CAP >= 100 * 1024 * 1024
_EDGE_TILE = 1024 if _BIG_VMEM else 512           # edge-row tile / M-chunk (multiple of 128)
_DST_TILE = 512 if _BIG_VMEM else 256             # destination-row tile


def _cp(grid_rank, reduce_last=False):
    sem = ["parallel"] * grid_rank
    if reduce_last:
        sem[-1] = "arbitrary"
    return pltpu.CompilerParams(dimension_semantics=tuple(sem),
                                vmem_limit_bytes=_VMEM_LIMIT)


def _round_up(n, m):
    return ((n + m - 1) // m) * m


def _choose_tile(n, target, granule=16):
    """Return (tile, padded_rows) with padded_rows % tile == 0.

    `target` is a multiple of 128, so whenever the axis is actually chunked the
    chunk size satisfies the (8,128)/lane-tiling divisibility rule; otherwise the
    single chunk equals the full (granule-padded) extent.
    """
    n_g = _round_up(max(n, 1), granule)
    if n_g <= target:
        return n_g, n_g
    return target, _round_up(n_g, target)


def _pad_rows(x, n_pad):
    n = x.shape[0]
    if n == n_pad:
        return x
    return jnp.concatenate([x, jnp.zeros((n_pad - n,) + x.shape[1:], x.dtype)], axis=0)


# ----------------------------------------------------------------------------
# kernels
# ----------------------------------------------------------------------------
def _edge_kernel(att_ref, *rest, kmsg, with_bin):
    if with_bin:
        bin_ref, wa_ref, ba_ref, vblk_ref, wg_ref, bg_ref, raw_ref, g_ref = rest
    else:
        wa_ref, ba_ref, vblk_ref, wg_ref, bg_ref, raw_ref, g_ref = rest

    att = att_ref[...]                                                   # bf16 [Te, Katt]
    a = jnp.dot(att, wa_ref[...], preferred_element_type=jnp.float32) + ba_ref[...]
    a = jnp.where(a > 0, a, 0.2 * a)                                     # LeakyReLU(0.2)
    # per-head dot with attn_vec as one block-diagonal matmul [D, H]
    raw = jnp.dot(a.astype(jnp.bfloat16), vblk_ref[...],
                  preferred_element_type=jnp.float32)
    if with_bin:
        raw = raw + bin_ref[...]
    raw_ref[...] = raw
    # message features are the zero-offset prefix of att (no duplicated msg input stream)
    g_ref[...] = jnp.dot(att[:, :kmsg], wg_ref[...],
                         preferred_element_type=jnp.float32) + bg_ref[...]


def _softmax_weight_kernel(raw_ref, maxe_ref, g_ref, expand_ref, av_ref, wgt_ref):
    # exact per-segment shift (maxe = segment max gathered back per edge) -> av <= 1
    av = jnp.exp(raw_ref[...] - maxe_ref[...])                           # [Te, H] f32
    av_ref[...] = av.astype(jnp.bfloat16)
    av_full = jnp.dot(av.astype(jnp.bfloat16), expand_ref[...],          # replicate per head
                      preferred_element_type=jnp.float32)                # [Te, D]
    wgt_ref[...] = (av_full * g_ref[...]).astype(jnp.bfloat16)


def _aggregate_kernel(dst_ref, av_ref, wgt_ref, x_ref, wres_ref, bres_ref, expand_ref,
                      out_ref, sums_acc, numer_acc, *, tile_rows):
    i = pl.program_id(0)                    # destination tile
    k = pl.program_id(1)                    # edge chunk (reduction axis)

    @pl.when(k == 0)
    def _():
        sums_acc[...] = jnp.zeros_like(sums_acc)
        numer_acc[...] = jnp.zeros_like(numer_acc)

    # Build the one-hot scatter matrix for this (dst tile, edge chunk) on the fly.
    row_ids = i * tile_rows + jax.lax.broadcasted_iota(
        jnp.int32, (tile_rows, dst_ref.shape[1]), 0)
    s = jnp.where(dst_ref[...] == row_ids, 1.0, 0.0).astype(jnp.bfloat16)  # [tile, Mc]

    sums_acc[...] += jnp.dot(s, av_ref[...], preferred_element_type=jnp.float32)
    numer_acc[...] += jnp.dot(s, wgt_ref[...], preferred_element_type=jnp.float32)

    @pl.when(k == pl.num_programs(1) - 1)
    def _():
        denom = jnp.dot(sums_acc[...], expand_ref[...],
                        preferred_element_type=jnp.float32) + 1e-16
        inv = pl.reciprocal(denom, approx=True)                          # EUP slot
        res = jnp.dot(x_ref[...], wres_ref[...],
                      preferred_element_type=jnp.float32) + bres_ref[...]
        out_ref[...] = jnp.maximum(numer_acc[...] * inv + res, 0.0)      # fused residual+ReLU


# ----------------------------------------------------------------------------
# pallas_call wrappers
# ----------------------------------------------------------------------------
def _edge_messages(att_in, bin_in, wa, ba, vblk, wg, bg, *, kmsg):
    m, katt = att_in.shape
    num_h = vblk.shape[1]
    dout = wg.shape[1]
    tile, m_pad = _choose_tile(m, _EDGE_TILE)
    att_p = _pad_rows(att_in, m_pad)
    wa_b, wg_b, vblk_b = (t.astype(jnp.bfloat16) for t in (wa, wg, vblk))

    in_specs = [pl.BlockSpec((tile, katt), lambda i: (i, 0))]
    args = [att_p]
    if bin_in is not None:
        in_specs.append(pl.BlockSpec((tile, num_h), lambda i: (i, 0)))
        args.append(_pad_rows(bin_in, m_pad))
    in_specs += [pl.BlockSpec(wa_b.shape, lambda i: (0, 0)),
                 pl.BlockSpec(ba.shape, lambda i: (0, 0)),
                 pl.BlockSpec(vblk_b.shape, lambda i: (0, 0)),
                 pl.BlockSpec(wg_b.shape, lambda i: (0, 0)),
                 pl.BlockSpec(bg.shape, lambda i: (0, 0))]
    args += [wa_b, ba, vblk_b, wg_b, bg]

    raw, g = pl.pallas_call(
        functools.partial(_edge_kernel, kmsg=kmsg, with_bin=bin_in is not None),
        grid=(m_pad // tile,),
        in_specs=in_specs,
        out_specs=[pl.BlockSpec((tile, num_h), lambda i: (i, 0)),
                   pl.BlockSpec((tile, dout), lambda i: (i, 0))],
        out_shape=(jax.ShapeDtypeStruct((m_pad, num_h), jnp.float32),
                   jax.ShapeDtypeStruct((m_pad, dout), jnp.float32)),
        compiler_params=_cp(1),
    )(*args)
    return raw, g, tile, m_pad


def _softmax_weights(raw, maxe, g, expand, tile):
    m_pad, num_h = raw.shape
    dout = g.shape[1]
    expand_b = expand.astype(jnp.bfloat16)
    av, wgt = pl.pallas_call(
        _softmax_weight_kernel,
        grid=(m_pad // tile,),
        in_specs=[pl.BlockSpec((tile, num_h), lambda i: (i, 0)),
                  pl.BlockSpec((tile, num_h), lambda i: (i, 0)),
                  pl.BlockSpec((tile, dout), lambda i: (i, 0)),
                  pl.BlockSpec(expand_b.shape, lambda i: (0, 0))],
        out_specs=[pl.BlockSpec((tile, num_h), lambda i: (i, 0)),
                   pl.BlockSpec((tile, dout), lambda i: (i, 0))],
        out_shape=(jax.ShapeDtypeStruct((m_pad, num_h), jnp.bfloat16),
                   jax.ShapeDtypeStruct((m_pad, dout), jnp.bfloat16)),
        compiler_params=_cp(1),
    )(raw, maxe, g, expand_b)
    return av, wgt


def _aggregate(dst_row, av, wgt, x, wres, bres, expand, m_chunk):
    n, din = x.shape
    m_pad, num_h = av.shape
    dout = wgt.shape[1]
    tile, n_pad = _choose_tile(n, _DST_TILE)
    x_p = _pad_rows(x.astype(jnp.bfloat16), n_pad)
    wres_b = wres.astype(jnp.bfloat16)

    out = pl.pallas_call(
        functools.partial(_aggregate_kernel, tile_rows=tile),
        grid=(n_pad // tile, m_pad // m_chunk),
        in_specs=[pl.BlockSpec((1, m_chunk), lambda i, k: (0, k)),       # dst indices
                  pl.BlockSpec((m_chunk, num_h), lambda i, k: (k, 0)),   # av chunk (bf16)
                  pl.BlockSpec((m_chunk, dout), lambda i, k: (k, 0)),    # weighted chunk (bf16)
                  pl.BlockSpec((tile, din), lambda i, k: (i, 0)),        # residual input
                  pl.BlockSpec(wres_b.shape, lambda i, k: (0, 0)),
                  pl.BlockSpec(bres.shape, lambda i, k: (0, 0)),
                  pl.BlockSpec(expand.shape, lambda i, k: (0, 0))],
        out_specs=pl.BlockSpec((tile, dout), lambda i, k: (i, 0)),
        out_shape=jax.ShapeDtypeStruct((n_pad, dout), jnp.float32),
        scratch_shapes=[pltpu.VMEM((tile, num_h), jnp.float32),
                        pltpu.VMEM((tile, dout), jnp.float32)],
        compiler_params=_cp(2, reduce_last=True),
    )(dst_row, av, wgt, x_p, wres_b, bres, expand)
    return out[:n]


# ----------------------------------------------------------------------------
# layer wrappers (XLA glue: gathers, self-loop scatter-mean, per-segment max)
# ----------------------------------------------------------------------------
def entity_layer(emb_ent, emb_rel, triplets, lp, wres, bres):
    E, Le = emb_ent.shape
    Lr = emb_rel.shape[1]
    T = triplets.shape[0]
    h_idx, r_idx, t_idx = triplets[:, 0], triplets[:, 1], triplets[:, 2]
    ar = jnp.arange(E, dtype=triplets.dtype)
    head_all = jnp.concatenate([h_idx, ar])               # self-loops appended
    tail_all = jnp.concatenate([t_idx, ar])
    M = T + E

    # self-loop relation feature: per-entity mean of incoming relation embeddings
    rel_g = emb_rel[r_idx]                                               # [T, Lr]
    freq = jnp.zeros((E, 1), jnp.float32).at[t_idx].add(1.0)
    self_rel = (jnp.zeros((E, Lr), jnp.float32).at[t_idx].add(rel_g)
                / jnp.maximum(freq, 1.0))                 # clamp: no NaN for isolated entities
    emb_rels = jnp.concatenate([rel_g, self_rel], axis=0)                # [M, Lr]

    # attention features ordered [head | rel | tail]; message features = prefix [head | rel]
    att_in = jnp.concatenate([emb_ent[head_all], emb_rels, emb_ent[tail_all]],
                             axis=-1).astype(jnp.bfloat16)               # [M, 2Le+Lr]

    raw, g, m_tile, m_pad = _edge_messages(att_in, None, lp["wa"], lp["ba"],
                                           lp["v_attn"], lp["wg"], lp["bg"],
                                           kmsg=Le + Lr)

    num_h = lp["expand"].shape[0]
    seg_max = jnp.full((E, num_h), -jnp.inf, jnp.float32).at[tail_all].max(raw[:M])
    maxe = _pad_rows(seg_max[tail_all], m_pad)                           # exact per-segment shift
    av, wgt = _softmax_weights(raw, maxe, g, lp["expand"], m_tile)

    dst = jnp.full((1, m_pad), -1, jnp.int32).at[0, :M].set(tail_all.astype(jnp.int32))
    return _aggregate(dst, av, wgt, emb_ent, wres, bres, lp["expand"], m_tile)


def relation_layer(emb_rel, relation_triplets, lp, wres, bres):
    R, Lr = emb_rel.shape
    Tr = relation_triplets.shape[0]
    hi, ti, bi = relation_triplets[:, 0], relation_triplets[:, 1], relation_triplets[:, 2]

    # attention features ordered [tail | head]; message features = prefix [tail]
    att_in = jnp.concatenate([emb_rel[ti], emb_rel[hi]], axis=-1).astype(jnp.bfloat16)
    bin_in = lp["attn_bin"][bi]                                          # [Tr, H]

    raw, g, m_tile, m_pad = _edge_messages(att_in, bin_in, lp["wa"], lp["ba"],
                                           lp["v_attn"], lp["wg"], lp["bg"], kmsg=Lr)

    num_h = lp["expand"].shape[0]
    seg_max = jnp.full((R, num_h), -jnp.inf, jnp.float32).at[hi].max(raw[:Tr])
    maxe = _pad_rows(seg_max[hi], m_pad)
    av, wgt = _softmax_weights(raw, maxe, g, lp["expand"], m_tile)

    dst = jnp.full((1, m_pad), -1, jnp.int32).at[0, :Tr].set(hi.astype(jnp.int32))
    # empty segments (relation never a head): numer=0 -> output 0, matching torch index_add
    return _aggregate(dst, av, wgt, emb_rel, wres, bres, lp["expand"], m_tile)


def _project(x, w, b):
    # tiny-K projections stay in XLA per review: a dedicated pallas_call is pure overhead here
    return jnp.dot(x, w, preferred_element_type=jnp.float32) + b


# ----------------------------------------------------------------------------
# parameter initialization (xavier-normal-like, biases zero)
# ----------------------------------------------------------------------------
def xavier(key, fan_in, fan_out, shape=None):
    std = math.sqrt(2.0) * math.sqrt(2.0 / (fan_in + fan_out))
    shape = (fan_in, fan_out) if shape is None else shape
    return (std * jax.random.normal(key, shape)).astype(jnp.float32)


def make_vattn(attn_vec):   # [H, Dh] -> block-diag [H*Dh, H]: a @ V == per-head dot with attn_vec
    H, Dh = attn_vec.shape
    D = H * Dh
    rows = jnp.arange(D)
    return jnp.zeros((D, H), jnp.float32).at[rows, rows // Dh].set(attn_vec.reshape(-1))


def make_expand(H, Dh):     # [H, H*Dh] 0/1: beta @ Expand replicates each head value over Dh lanes
    D = H * Dh
    rows = jnp.arange(D)
    return jnp.zeros((H, D), jnp.float32).at[rows // Dh, rows].set(1.0)


def init_params(key, dim_ent, ratio_ent, dim_rel, ratio_rel, num_bin,
                num_layer_ent, num_layer_rel, num_head):
    Le = ratio_ent * dim_ent
    Lr = ratio_rel * dim_rel
    Dhe, Dhr = Le // num_head, Lr // num_head
    keys = iter(jax.random.split(key, 8 + 4 * (num_layer_ent + num_layer_rel)))
    nxt = lambda: next(keys)

    p = {
        "ent_proj1_w": xavier(nxt(), dim_ent, Le), "ent_proj1_b": jnp.zeros((1, Le), jnp.float32),
        "ent_proj2_w": xavier(nxt(), Le, dim_ent), "ent_proj2_b": jnp.zeros((1, dim_ent), jnp.float32),
        "rel_proj1_w": xavier(nxt(), dim_rel, Lr), "rel_proj1_b": jnp.zeros((1, Lr), jnp.float32),
        "rel_proj2_w": xavier(nxt(), Lr, dim_rel), "rel_proj2_b": jnp.zeros((1, dim_rel), jnp.float32),
    }

    expand_e, expand_r = make_expand(num_head, Dhe), make_expand(num_head, Dhr)

    # NOTE: wa rows are ordered for the in-kernel feature layout ([head|rel|tail] / [tail|head]).
    p["ent_layers"] = []
    for _ in range(num_layer_ent):
        av = xavier(nxt(), num_head * Dhe, Dhe, shape=(num_head, Dhe))
        p["ent_layers"].append(dict(
            wa=xavier(nxt(), 2 * Le + Lr, Le), ba=jnp.zeros((1, Le), jnp.float32),
            wg=xavier(nxt(), Le + Lr, Le), bg=jnp.zeros((1, Le), jnp.float32),
            v_attn=make_vattn(av), expand=expand_e,
        ))

    p["rel_layers"] = []
    for _ in range(num_layer_rel):
        av = xavier(nxt(), num_head * Dhr, Dhr, shape=(num_head, Dhr))
        p["rel_layers"].append(dict(
            wa=xavier(nxt(), 2 * Lr, Lr), ba=jnp.zeros((1, Lr), jnp.float32),
            wg=xavier(nxt(), Lr, Lr), bg=jnp.zeros((1, Lr), jnp.float32),
            v_attn=make_vattn(av), expand=expand_r,
            attn_bin=jnp.zeros((num_bin, num_head), jnp.float32),   # torch leaves it zero
        ))

    p["res_ent"] = [(xavier(nxt(), Le, Le), jnp.zeros((1, Le), jnp.float32))
                    for _ in range(num_layer_ent)]
    p["res_rel"] = [(xavier(nxt(), Lr, Lr), jnp.zeros((1, Lr), jnp.float32))
                    for _ in range(num_layer_rel)]
    return p


# ----------------------------------------------------------------------------
# full InGram forward
# ----------------------------------------------------------------------------
def ingram_forward(params, emb_ent, emb_rel, triplets, relation_triplets):
    x_ent = _project(emb_ent, params["ent_proj1_w"], params["ent_proj1_b"])
    x_rel = _project(emb_rel, params["rel_proj1_w"], params["rel_proj1_b"])

    for lp, (rw, rb) in zip(params["rel_layers"], params["res_rel"]):
        x_rel = relation_layer(x_rel, relation_triplets, lp, rw, rb)     # residual+ReLU fused

    for lp, (rw, rb) in zip(params["ent_layers"], params["res_ent"]):
        x_ent = entity_layer(x_ent, x_rel, triplets, lp, rw, rb)

    return (_project(x_ent, params["ent_proj2_w"], params["ent_proj2_b"]),
            _project(x_rel, params["rel_proj2_w"], params["rel_proj2_b"]))


# ----------------------------------------------------------------------------
if __name__ == "__main__":
    key = jax.random.PRNGKey(0)
    k_par, k_e, k_r, k_h, k_rel, k_t, k_rh, k_rt = jax.random.split(key, 8)

    dim_ent, ratio_ent = 16, 2          # layer_dim_ent = 32
    dim_rel, ratio_rel = 16, 2          # layer_dim_rel = 32
    num_bin, num_head = 10, 8
    num_layer_ent, num_layer_rel = 2, 2
    num_ent, num_rel, T, Tr = 16, 8, 32, 16

    params = init_params(k_par, dim_ent, ratio_ent, dim_rel, ratio_rel,
                         num_bin, num_layer_ent, num_layer_rel, num_head)

    emb_ent = jax.random.normal(k_e, (num_ent, dim_ent), jnp.float32)
    emb_rel = jax.random.normal(k_r, (num_rel, dim_rel), jnp.float32)

    # triplets [T, 3] = (head, relation, tail); every entity appears as a tail
    # at least once so that ent_freq > 0 (matches the model's expectations).
    heads = jax.random.randint(k_h, (T,), 0, num_ent)
    rels = jax.random.randint(k_rel, (T,), 0, num_rel)
    tails = jnp.concatenate([jnp.arange(num_ent),
                             jax.random.randint(k_t, (T - num_ent,), 0, num_ent)])
    triplets = jnp.stack([heads, rels, tails], axis=1).astype(jnp.int32)

    # relation_triplets [Tr, 3] = (head_rel, tail_rel, bin)
    r_heads = jnp.concatenate([jnp.arange(num_rel),
                               jax.random.randint(k_rh, (Tr - num_rel,), 0, num_rel)])
    r_tails = jax.random.randint(k_rt, (Tr,), 0, num_rel)
    r_bins = jnp.arange(Tr) % num_bin
    relation_triplets = jnp.stack([r_heads, r_tails, r_bins], axis=1).astype(jnp.int32)

    fwd = jax.jit(ingram_forward)
    out_ent, out_rel = fwd(params, emb_ent, emb_rel, triplets, relation_triplets)
    jax.block_until_ready((out_ent, out_rel))

    assert out_ent.shape == (num_ent, dim_ent)
    assert out_rel.shape == (num_rel, dim_rel)
    assert bool(jnp.all(jnp.isfinite(out_ent))) and bool(jnp.all(jnp.isfinite(out_rel)))
    print("KERNEL_OK")
</pallas_src>

<mosaic_0001>
module attributes {stable_mosaic.version = 11 : i64} {
  func.func private @main(%arg0: i32) attributes {dimension_semantics = [#tpu.dimension_semantics<core_parallel>], iteration_bounds = array<i64: 2>, tpu.core_type = #tpu.core_type<sc_scalar_subcore>, window_params = []} {
    return
  }
}

module attributes {stable_mosaic.version = 11 : i64} {
  func.func private @main(%arg0: i32) attributes {dimension_semantics = [#tpu.dimension_semantics<core_parallel>], iteration_bounds = array<i64: 2>, tpu.core_type = #tpu.core_type<sc_scalar_subcore>, window_params = []} {
    return
  }
}

module attributes {stable_mosaic.version = 11 : i64} {
  func.func @_edge_kernel(%arg0: i32, %arg1: memref<16x64xbf16, #tpu.memory_space<vmem>>, %arg2: memref<16x8xf32, #tpu.memory_space<vmem>>, %arg3: memref<64x32xbf16, #tpu.memory_space<vmem>>, %arg4: memref<1x32xf32, #tpu.memory_space<vmem>>, %arg5: memref<32x8xbf16, #tpu.memory_space<vmem>>, %arg6: memref<32x32xbf16, #tpu.memory_space<vmem>>, %arg7: memref<1x32xf32, #tpu.memory_space<vmem>>, %arg8: memref<16x8xf32, #tpu.memory_space<vmem>>, %arg9: memref<16x32xf32, #tpu.memory_space<vmem>>) attributes {dimension_semantics = [#tpu.dimension_semantics<parallel>], iteration_bounds = array<i64: 1>, scalar_prefetch = 0 : i64, scratch_operands = 0 : i64, tpu.core_type = #tpu.core_type<tc>, window_params = [{transform_indices = @transform_0, window_bounds = array<i64: 16, 64>}, {transform_indices = @transform_1, window_bounds = array<i64: 16, 8>}, {pipeline_mode = #tpu.pipeline_mode<synchronous>, transform_indices = @transform_2, window_bounds = array<i64: 64, 32>}, {pipeline_mode = #tpu.pipeline_mode<synchronous>, transform_indices = @transform_3, window_bounds = array<i64: 1, 32>}, {pipeline_mode = #tpu.pipeline_mode<synchronous>, transform_indices = @transform_4, window_bounds = array<i64: 32, 8>}, {pipeline_mode = #tpu.pipeline_mode<synchronous>, transform_indices = @transform_5, window_bounds = array<i64: 32, 32>}, {pipeline_mode = #tpu.pipeline_mode<synchronous>, transform_indices = @transform_6, window_bounds = array<i64: 1, 32>}, {transform_indices = @transform_7, window_bounds = array<i64: 16, 8>}, {transform_indices = @transform_8, window_bounds = array<i64: 16, 32>}]} {
    %c0 = arith.constant 0 : index
    %c0_0 = arith.constant 0 : index
    %0 = vector.load %arg1[%c0, %c0_0] : memref<16x64xbf16, #tpu.memory_space<vmem>>, vector<16x64xbf16>
    %c0_1 = arith.constant 0 : index
    %c0_2 = arith.constant 0 : index
    %1 = vector.load %arg3[%c0_1, %c0_2] : memref<64x32xbf16, #tpu.memory_space<vmem>>, vector<64x32xbf16>
    %cst = arith.constant dense<0.000000e+00> : vector<16x32xf32>
    %2 = tpu.matmul %0, %1, %cst {dimension_numbers = #tpu.dot_dimension_numbers<[1], [0], [0], [1], [0, 0, 1, 1], [], []>} : vector<16x64xbf16>, vector<64x32xbf16>, vector<16x32xf32> -> vector<16x32xf32>
    %c0_3 = arith.constant 0 : index
    %c0_4 = arith.constant 0 : index
    %3 = vector.load %arg4[%c0_3, %c0_4] : memref<1x32xf32, #tpu.memory_space<vmem>>, vector<1x32xf32>
    %4 = vector.broadcast %3 : vector<1x32xf32> to vector<16x32xf32>
    %5 = arith.addf %2, %4 : vector<16x32xf32>
    %cst_5 = arith.constant 0.000000e+00 : f32
    %6 = vector.broadcast %cst_5 : f32 to vector<16x32xf32>
    %7 = arith.cmpf ogt, %5, %6 : vector<16x32xf32>
    %cst_6 = arith.constant 2.000000e-01 : f32
    %8 = vector.broadcast %cst_6 : f32 to vector<16x32xf32>
    %9 = arith.mulf %8, %5 : vector<16x32xf32>
    %10 = arith.select %7, %5, %9 : vector<16x32xi1>, vector<16x32xf32>
    %11 = arith.truncf %10 : vector<16x32xf32> to vector<16x32xbf16>
    %c0_7 = arith.constant 0 : index
    %c0_8 = arith.constant 0 : index
    %12 = vector.load %arg5[%c0_7, %c0_8] : memref<32x8xbf16, #tpu.memory_space<vmem>>, vector<32x8xbf16>
    %cst_9 = arith.constant dense<0.000000e+00> : vector<16x8xf32>
    %13 = tpu.matmul %11, %12, %cst_9 {dimension_numbers = #tpu.dot_dimension_numbers<[1], [0], [0], [1], [0, 0, 1, 1], [], []>} : vector<16x32xbf16>, vector<32x8xbf16>, vector<16x8xf32> -> vector<16x8xf32>
    %c0_10 = arith.constant 0 : index
    %c0_11 = arith.constant 0 : index
    %14 = vector.load %arg2[%c0_10, %c0_11] : memref<16x8xf32, #tpu.memory_space<vmem>>, vector<16x8xf32>
    %15 = arith.addf %13, %14 : vector<16x8xf32>
    %c0_12 = arith.constant 0 : index
    %c0_13 = arith.constant 0 : index
    %16 = vector.load %arg8[%c0_12, %c0_13] : memref<16x8xf32, #tpu.memory_space<vmem>>, vector<16x8xf32>
    tpu.vector_store %arg8[%c0_12, %c0_13], %15 {strides = array<i32>} : memref<16x8xf32, #tpu.memory_space<vmem>>, vector<16x8xf32>,
    %17 = vector.extract_strided_slice %0 {offsets = [0, 0], sizes = [16, 32], strides = [1, 1]} : vector<16x64xbf16> to vector<16x32xbf16>
    %c0_14 = arith.constant 0 : index
    %c0_15 = arith.constant 0 : index
    %18 = vector.load %arg6[%c0_14, %c0_15] : memref<32x32xbf16, #tpu.memory_space<vmem>>, vector<32x32xbf16>
    %cst_16 = arith.constant dense<0.000000e+00> : vector<16x32xf32>
    %19 = tpu.matmul %17, %18, %cst_16 {dimension_numbers = #tpu.dot_dimension_numbers<[1], [0], [0], [1], [0, 0, 1, 1], [], []>} : vector<16x32xbf16>, vector<32x32xbf16>, vector<16x32xf32> -> vector<16x32xf32>
    %c0_17 = arith.constant 0 : index
    %c0_18 = arith.constant 0 : index
    %20 = vector.load %arg7[%c0_17, %c0_18] : memref<1x32xf32, #tpu.memory_space<vmem>>, vector<1x32xf32>
    %21 = vector.broadcast %20 : vector<1x32xf32> to vector<16x32xf32>
    %22 = arith.addf %19, %21 : vector<16x32xf32>
    %c0_19 = arith.constant 0 : index
    %c0_20 = arith.constant 0 : index
    %23 = vector.load %arg9[%c0_19, %c0_20] : memref<16x32xf32, #tpu.memory_space<vmem>>, vector<16x32xf32>
    tpu.vector_store %arg9[%c0_19, %c0_20], %22 {strides = array<i32>} : memref<16x32xf32, #tpu.memory_space<vmem>>, vector<16x32xf32>,
    return
  }
  func.func @transform_0(%arg0: i32) -> (i32, i32) {
    %c0_i32 = arith.constant 0 : i32
    %c0_i32_0 = arith.constant 0 : i32
    return %arg0, %c0_i32 : i32, i32
  }
  func.func @transform_1(%arg0: i32) -> (i32, i32) {
    %c0_i32 = arith.constant 0 : i32
    %c0_i32_0 = arith.constant 0 : i32
    return %arg0, %c0_i32 : i32, i32
  }
  func.func @transform_2(%arg0: i32) -> (i32, i32) {
    %c0_i32 = arith.constant 0 : i32
    %c0_i32_0 = arith.constant 0 : i32
    %c0_i32_1 = arith.constant 0 : i32
    return %c0_i32, %c0_i32_0 : i32, i32
  }
  func.func @transform_3(%arg0: i32) -> (i32, i32) {
    %c0_i32 = arith.constant 0 : i32
    %c0_i32_0 = arith.constant 0 : i32
    %c0_i32_1 = arith.constant 0 : i32
    return %c0_i32, %c0_i32_0 : i32, i32
  }
  func.func @transform_4(%arg0: i32) -> (i32, i32) {
    %c0_i32 = arith.constant 0 : i32
    %c0_i32_0 = arith.constant 0 : i32
    %c0_i32_1 = arith.constant 0 : i32
    return %c0_i32, %c0_i32_0 : i32, i32
  }
  func.func @transform_5(%arg0: i32) -> (i32, i32) {
    %c0_i32 = arith.constant 0 : i32
    %c0_i32_0 = arith.constant 0 : i32
    %c0_i32_1 = arith.constant 0 : i32
    return %c0_i32, %c0_i32_0 : i32, i32
  }
  func.func @transform_6(%arg0: i32) -> (i32, i32) {
    %c0_i32 = arith.constant 0 : i32
    %c0_i32_0 = arith.constant 0 : i32
    %c0_i32_1 = arith.constant 0 : i32
    return %c0_i32, %c0_i32_0 : i32, i32
  }
  func.func @transform_7(%arg0: i32) -> (i32, i32) {
    %c0_i32 = arith.constant 0 : i32
    %c0_i32_0 = arith.constant 0 : i32
    return %arg0, %c0_i32 : i32, i32
  }
  func.func @transform_8(%arg0: i32) -> (i32, i32) {
    %c0_i32 = arith.constant 0 : i32
    %c0_i32_0 = arith.constant 0 : i32
    return %arg0, %c0_i32 : i32, i32
  }
}

module attributes {stable_mosaic.version = 11 : i64} {
  func.func @_softmax_weight_kernel(%arg0: i32, %arg1: memref<16x8xf32, #tpu.memory_space<vmem>>, %arg2: memref<16x8xf32, #tpu.memory_space<vmem>>, %arg3: memref<16x32xf32, #tpu.memory_space<vmem>>, %arg4: memref<8x32xbf16, #tpu.memory_space<vmem>>, %arg5: memref<16x8xbf16, #tpu.memory_space<vmem>>, %arg6: memref<16x32xbf16, #tpu.memory_space<vmem>>) attributes {dimension_semantics = [#tpu.dimension_semantics<parallel>], iteration_bounds = array<i64: 1>, scalar_prefetch = 0 : i64, scratch_operands = 0 : i64, tpu.core_type = #tpu.core_type<tc>, window_params = [{transform_indices = @transform_0, window_bounds = array<i64: 16, 8>}, {transform_indices = @transform_1, window_bounds = array<i64: 16, 8>}, {transform_indices = @transform_2, window_bounds = array<i64: 16, 32>}, {pipeline_mode = #tpu.pipeline_mode<synchronous>, transform_indices = @transform_3, window_bounds = array<i64: 8, 32>}, {transform_indices = @transform_4, window_bounds = array<i64: 16, 8>}, {transform_indices = @transform_5, window_bounds = array<i64: 16, 32>}]} {
    %c0 = arith.constant 0 : index
    %c0_0 = arith.constant 0 : index
    %0 = vector.load %arg1[%c0, %c0_0] : memref<16x8xf32, #tpu.memory_space<vmem>>, vector<16x8xf32>
    %c0_1 = arith.constant 0 : index
    %c0_2 = arith.constant 0 : index
    %1 = vector.load %arg2[%c0_1, %c0_2] : memref<16x8xf32, #tpu.memory_space<vmem>>, vector<16x8xf32>
    %2 = arith.subf %0, %1 : vector<16x8xf32>
    %3 = math.exp %2 : vector<16x8xf32>
    %4 = arith.truncf %3 : vector<16x8xf32> to vector<16x8xbf16>
    %c0_3 = arith.constant 0 : index
    %c0_4 = arith.constant 0 : index
    %5 = vector.load %arg5[%c0_3, %c0_4] : memref<16x8xbf16, #tpu.memory_space<vmem>>, vector<16x8xbf16>
    tpu.vector_store %arg5[%c0_3, %c0_4], %4 {strides = array<i32>} : memref<16x8xbf16, #tpu.memory_space<vmem>>, vector<16x8xbf16>,
    %6 = arith.truncf %3 : vector<16x8xf32> to vector<16x8xbf16>
    %c0_5 = arith.constant 0 : index
    %c0_6 = arith.constant 0 : index
    %7 = vector.load %arg4[%c0_5, %c0_6] : memref<8x32xbf16, #tpu.memory_space<vmem>>, vector<8x32xbf16>
    %cst = arith.constant dense<0.000000e+00> : vector<16x32xf32>
    %8 = tpu.matmul %6, %7, %cst {dimension_numbers = #tpu.dot_dimension_numbers<[1], [0], [0], [1], [0, 0, 1, 1], [], []>} : vector<16x8xbf16>, vector<8x32xbf16>, vector<16x32xf32> -> vector<16x32xf32>
    %c0_7 = arith.constant 0 : index
    %c0_8 = arith.constant 0 : index
    %9 = vector.load %arg3[%c0_7, %c0_8] : memref<16x32xf32, #tpu.memory_space<vmem>>, vector<16x32xf32>
    %10 = arith.mulf %8, %9 : vector<16x32xf32>
    %11 = arith.truncf %10 : vector<16x32xf32> to vector<16x32xbf16>
    %c0_9 = arith.constant 0 : index
    %c0_10 = arith.constant 0 : index
    %12 = vector.load %arg6[%c0_9, %c0_10] : memref<16x32xbf16, #tpu.memory_space<vmem>>, vector<16x32xbf16>
    tpu.vector_store %arg6[%c0_9, %c0_10], %11 {strides = array<i32>} : memref<16x32xbf16, #tpu.memory_space<vmem>>, vector<16x32xbf16>,
    return
  }
  func.func @transform_0(%arg0: i32) -> (i32, i32) {
    %c0_i32 = arith.constant 0 : i32
    %c0_i32_0 = arith.constant 0 : i32
    return %arg0, %c0_i32 : i32, i32
  }
  func.func @transform_1(%arg0: i32) -> (i32, i32) {
    %c0_i32 = arith.constant 0 : i32
    %c0_i32_0 = arith.constant 0 : i32
    return %arg0, %c0_i32 : i32, i32
  }
  func.func @transform_2(%arg0: i32) -> (i32, i32) {
    %c0_i32 = arith.constant 0 : i32
    %c0_i32_0 = arith.constant 0 : i32
    return %arg0, %c0_i32 : i32, i32
  }
  func.func @transform_3(%arg0: i32) -> (i32, i32) {
    %c0_i32 = arith.constant 0 : i32
    %c0_i32_0 = arith.constant 0 : i32
    %c0_i32_1 = arith.constant 0 : i32
    return %c0_i32, %c0_i32_0 : i32, i32
  }
  func.func @transform_4(%arg0: i32) -> (i32, i32) {
    %c0_i32 = arith.constant 0 : i32
    %c0_i32_0 = arith.constant 0 : i32
    return %arg0, %c0_i32 : i32, i32
  }
  func.func @transform_5(%arg0: i32) -> (i32, i32) {
    %c0_i32 = arith.constant 0 : i32
    %c0_i32_0 = arith.constant 0 : i32
    return %arg0, %c0_i32 : i32, i32
  }
}

module attributes {stable_mosaic.version = 11 : i64} {
  func.func @_aggregate_kernel(%arg0: i32, %arg1: i32, %arg2: memref<1x16xi32, #tpu.memory_space<vmem>>, %arg3: memref<16x8xbf16, #tpu.memory_space<vmem>>, %arg4: memref<16x32xbf16, #tpu.memory_space<vmem>>, %arg5: memref<16x32xbf16, #tpu.memory_space<vmem>>, %arg6: memref<32x32xbf16, #tpu.memory_space<vmem>>, %arg7: memref<1x32xf32, #tpu.memory_space<vmem>>, %arg8: memref<8x32xf32, #tpu.memory_space<vmem>>, %arg9: memref<16x32xf32, #tpu.memory_space<vmem>>, %arg10: memref<16x8xf32, #tpu.memory_space<vmem>>, %arg11: memref<16x32xf32, #tpu.memory_space<vmem>>) attributes {dimension_semantics = [#tpu.dimension_semantics<parallel>, #tpu.dimension_semantics<arbitrary>], iteration_bounds = array<i64: 1, 1>, scalar_prefetch = 0 : i64, scratch_operands = 2 : i64, tpu.core_type = #tpu.core_type<tc>, window_params = [{transform_indices = @transform_0, window_bounds = array<i64: 1, 16>}, {transform_indices = @transform_1, window_bounds = array<i64: 16, 8>}, {transform_indices = @transform_2, window_bounds = array<i64: 16, 32>}, {transform_indices = @transform_3, window_bounds = array<i64: 16, 32>}, {pipeline_mode = #tpu.pipeline_mode<synchronous>, transform_indices = @transform_4, window_bounds = array<i64: 32, 32>}, {pipeline_mode = #tpu.pipeline_mode<synchronous>, transform_indices = @transform_5, window_bounds = array<i64: 1, 32>}, {pipeline_mode = #tpu.pipeline_mode<synchronous>, transform_indices = @transform_6, window_bounds = array<i64: 8, 32>}, {transform_indices = @transform_7, window_bounds = array<i64: 16, 32>}]} {
    %c0_i32 = arith.constant 0 : i32
    %0 = arith.cmpi eq, %arg1, %c0_i32 : i32
    %1 = arith.extui %0 : i1 to i32
    %c0_i32_0 = arith.constant 0 : i32
    %2 = arith.cmpi ne, %1, %c0_i32_0 : i32
    scf.if %2 {
      %cst_19 = arith.constant 0.000000e+00 : f32
      %27 = vector.broadcast %cst_19 : f32 to vector<16x8xf32>
      %c0_20 = arith.constant 0 : index
      %c0_21 = arith.constant 0 : index
      %28 = vector.load %arg10[%c0_20, %c0_21] : memref<16x8xf32, #tpu.memory_space<vmem>>, vector<16x8xf32>
      tpu.vector_store %arg10[%c0_20, %c0_21], %27 {strides = array<i32>} : memref<16x8xf32, #tpu.memory_space<vmem>>, vector<16x8xf32>,
      %cst_22 = arith.constant 0.000000e+00 : f32
      %29 = vector.broadcast %cst_22 : f32 to vector<16x32xf32>
      %c0_23 = arith.constant 0 : index
      %c0_24 = arith.constant 0 : index
      %30 = vector.load %arg11[%c0_23, %c0_24] : memref<16x32xf32, #tpu.memory_space<vmem>>, vector<16x32xf32>
      tpu.vector_store %arg11[%c0_23, %c0_24], %29 {strides = array<i32>} : memref<16x32xf32, #tpu.memory_space<vmem>>, vector<16x32xf32>,
    } else {
    }
    %c16_i32 = arith.constant 16 : i32
    %3 = arith.muli %arg0, %c16_i32 : i32
    %4 = tpu.iota {dimensions = array<i32: 0>} : vector<16x16xi32>
    %5 = vector.broadcast %3 : i32 to vector<16x16xi32>
    %6 = arith.addi %5, %4 : vector<16x16xi32>
    %c0 = arith.constant 0 : index
    %c0_1 = arith.constant 0 : index
    %7 = vector.load %arg2[%c0, %c0_1] : memref<1x16xi32, #tpu.memory_space<vmem>>, vector<1x16xi32>
    %8 = vector.broadcast %7 : vector<1x16xi32> to vector<16x16xi32>
    %9 = arith.cmpi eq, %8, %6 : vector<16x16xi32>
    %cst = arith.constant 1.000000e+00 : f32
    %cst_2 = arith.constant 0.000000e+00 : f32
    %10 = vector.broadcast %cst : f32 to vector<16x16xf32>
    %11 = vector.broadcast %cst_2 : f32 to vector<16x16xf32>
    %12 = arith.select %9, %10, %11 : vector<16x16xi1>, vector<16x16xf32>
    %13 = arith.truncf %12 : vector<16x16xf32> to vector<16x16xbf16>
    %c0_3 = arith.constant 0 : index
    %c0_4 = arith.constant 0 : index
    %14 = vector.load %arg10[%c0_3, %c0_4] : memref<16x8xf32, #tpu.memory_space<vmem>>, vector<16x8xf32>
    %c0_5 = arith.constant 0 : index
    %c0_6 = arith.constant 0 : index
    %15 = vector.load %arg3[%c0_5, %c0_6] : memref<16x8xbf16, #tpu.memory_space<vmem>>, vector<16x8xbf16>
    %cst_7 = arith.constant dense<0.000000e+00> : vector<16x8xf32>
    %16 = tpu.matmul %13, %15, %cst_7 {dimension_numbers = #tpu.dot_dimension_numbers<[1], [0], [0], [1], [0, 0, 1, 1], [], []>} : vector<16x16xbf16>, vector<16x8xbf16>, vector<16x8xf32> -> vector<16x8xf32>
    %17 = arith.addf %14, %16 : vector<16x8xf32>
    %c0_8 = arith.constant 0 : index
    %c0_9 = arith.constant 0 : index
    %18 = vector.load %arg10[%c0_8, %c0_9] : memref<16x8xf32, #tpu.memory_space<vmem>>, vector<16x8xf32>
    tpu.vector_store %arg10[%c0_8, %c0_9], %17 {strides = array<i32>} : memref<16x8xf32, #tpu.memory_space<vmem>>, vector<16x8xf32>,
    %c0_10 = arith.constant 0 : index
    %c0_11 = arith.constant 0 : index
    %19 = vector.load %arg11[%c0_10, %c0_11] : memref<16x32xf32, #tpu.memory_space<vmem>>, vector<16x32xf32>
    %c0_12 = arith.constant 0 : index
    %c0_13 = arith.constant 0 : index
    %20 = vector.load %arg4[%c0_12, %c0_13] : memref<16x32xbf16, #tpu.memory_space<vmem>>, vector<16x32xbf16>
    %cst_14 = arith.constant dense<0.000000e+00> : vector<16x32xf32>
    %21 = tpu.matmul %13, %20, %cst_14 {dimension_numbers = #tpu.dot_dimension_numbers<[1], [0], [0], [1], [0, 0, 1, 1], [], []>} : vector<16x16xbf16>, vector<16x32xbf16>, vector<16x32xf32> -> vector<16x32xf32>
    %22 = arith.addf %19, %21 : vector<16x32xf32>
    %c0_15 = arith.constant 0 : index
    %c0_16 = arith.constant 0 : index
    %23 = vector.load %arg11[%c0_15, %c0_16] : memref<16x32xf32, #tpu.memory_space<vmem>>, vector<16x32xf32>
    tpu.vector_store %arg11[%c0_15, %c0_16], %22 {strides = array<i32>} : memref<16x32xf32, #tpu.memory_space<vmem>>, vector<16x32xf32>,
    %c0_i32_17 = arith.constant 0 : i32
    %24 = arith.cmpi eq, %arg1, %c0_i32_17 : i32
    %25 = arith.extui %24 : i1 to i32
    %c0_i32_18 = arith.constant 0 : i32
    %26 = arith.cmpi ne, %25, %c0_i32_18 : i32
    scf.if %26 {
      %c0_19 = arith.constant 0 : index
      %c0_20 = arith.constant 0 : index
      %27 = vector.load %arg10[%c0_19, %c0_20] : memref<16x8xf32, #tpu.memory_space<vmem>>, vector<16x8xf32>
      %c0_21 = arith.constant 0 : index
      %c0_22 = arith.constant 0 : index
      %28 = vector.load %arg8[%c0_21, %c0_22] : memref<8x32xf32, #tpu.memory_space<vmem>>, vector<8x32xf32>
      %cst_23 = arith.constant dense<0.000000e+00> : vector<16x32xf32>
      %29 = tpu.matmul %27, %28, %cst_23 {dimension_numbers = #tpu.dot_dimension_numbers<[1], [0], [0], [1], [0, 0, 1, 1], [], []>} : vector<16x8xf32>, vector<8x32xf32>, vector<16x32xf32> -> vector<16x32xf32>
      %cst_24 = arith.constant 1.000000e-16 : f32
      %30 = vector.broadcast %cst_24 : f32 to vector<16x32xf32>
      %31 = arith.addf %29, %30 : vector<16x32xf32>
      %32 = tpu.reciprocal %31 {approx = true} : vector<16x32xf32> -> vector<16x32xf32>
      %c0_25 = arith.constant 0 : index
      %c0_26 = arith.constant 0 : index
      %33 = vector.load %arg5[%c0_25, %c0_26] : memref<16x32xbf16, #tpu.memory_space<vmem>>, vector<16x32xbf16>
      %c0_27 = arith.constant 0 : index
      %c0_28 = arith.constant 0 : index
      %34 = vector.load %arg6[%c0_27, %c0_28] : memref<32x32xbf16, #tpu.memory_space<vmem>>, vector<32x32xbf16>
      %cst_29 = arith.constant dense<0.000000e+00> : vector<16x32xf32>
      %35 = tpu.matmul %33, %34, %cst_29 {dimension_numbers = #tpu.dot_dimension_numbers<[1], [0], [0], [1], [0, 0, 1, 1], [], []>} : vector<16x32xbf16>, vector<32x32xbf16>, vector<16x32xf32> -> vector<16x32xf32>
      %c0_30 = arith.constant 0 : index
      %c0_31 = arith.constant 0 : index
      %36 = vector.load %arg7[%c0_30, %c0_31] : memref<1x32xf32, #tpu.memory_space<vmem>>, vector<1x32xf32>
      %37 = vector.broadcast %36 : vector<1x32xf32> to vector<16x32xf32>
      %38 = arith.addf %35, %37 : vector<16x32xf32>
      %c0_32 = arith.constant 0 : index
      %c0_33 = arith.constant 0 : index
      %39 = vector.load %arg11[%c0_32, %c0_33] : memref<16x32xf32, #tpu.memory_space<vmem>>, vector<16x32xf32>
      %40 = arith.mulf %39, %32 : vector<16x32xf32>
      %41 = arith.addf %40, %38 : vector<16x32xf32>
      %cst_34 = arith.constant 0.000000e+00 : f32
      %42 = vector.broadcast %cst_34 : f32 to vector<16x32xf32>
      %43 = arith.maximumf %41, %42 : vector<16x32xf32>
      %c0_35 = arith.constant 0 : index
      %c0_36 = arith.constant 0 : index
      %44 = vector.load %arg9[%c0_35, %c0_36] : memref<16x32xf32, #tpu.memory_space<vmem>>, vector<16x32xf32>
      tpu.vector_store %arg9[%c0_35, %c0_36], %43 {strides = array<i32>} : memref<16x32xf32, #tpu.memory_space<vmem>>, vector<16x32xf32>,
    } else {
    }
    return
  }
  func.func @transform_0(%arg0: i32, %arg1: i32) -> (i32, i32) {
    %c0_i32 = arith.constant 0 : i32
    %c0_i32_0 = arith.constant 0 : i32
    return %c0_i32, %arg1 : i32, i32
  }
  func.func @transform_1(%arg0: i32, %arg1: i32) -> (i32, i32) {
    %c0_i32 = arith.constant 0 : i32
    %c0_i32_0 = arith.constant 0 : i32
    return %arg1, %c0_i32 : i32, i32
  }
  func.func @transform_2(%arg0: i32, %arg1: i32) -> (i32, i32) {
    %c0_i32 = arith.constant 0 : i32
    %c0_i32_0 = arith.constant 0 : i32
    return %arg1, %c0_i32 : i32, i32
  }
  func.func @transform_3(%arg0: i32, %arg1: i32) -> (i32, i32) {
    %c0_i32 = arith.constant 0 : i32
    %c0_i32_0 = arith.constant 0 : i32
    return %arg0, %c0_i32 : i32, i32
  }
  func.func @transform_4(%arg0: i32, %arg1: i32) -> (i32, i32) {
    %c0_i32 = arith.constant 0 : i32
    %c0_i32_0 = arith.constant 0 : i32
    %c0_i32_1 = arith.constant 0 : i32
    return %c0_i32, %c0_i32_0 : i32, i32
  }
  func.func @transform_5(%arg0: i32, %arg1: i32) -> (i32, i32) {
    %c0_i32 = arith.constant 0 : i32
    %c0_i32_0 = arith.constant 0 : i32
    %c0_i32_1 = arith.constant 0 : i32
    return %c0_i32, %c0_i32_0 : i32, i32
  }
  func.func @transform_6(%arg0: i32, %arg1: i32) -> (i32, i32) {
    %c0_i32 = arith.constant 0 : i32
    %c0_i32_0 = arith.constant 0 : i32
    %c0_i32_1 = arith.constant 0 : i32
    return %c0_i32, %c0_i32_0 : i32, i32
  }
  func.func @transform_7(%arg0: i32, %arg1: i32) -> (i32, i32) {
    %c0_i32 = arith.constant 0 : i32
    %c0_i32_0 = arith.constant 0 : i32
    return %arg0, %c0_i32 : i32, i32
  }
}

module attributes {stable_mosaic.version = 11 : i64} {
  func.func @_softmax_weight_kernel(%arg0: i32, %arg1: memref<48x8xf32, #tpu.memory_space<vmem>>, %arg2: memref<48x8xf32, #tpu.memory_space<vmem>>, %arg3: memref<48x32xf32, #tpu.memory_space<vmem>>, %arg4: memref<8x32xbf16, #tpu.memory_space<vmem>>, %arg5: memref<48x8xbf16, #tpu.memory_space<vmem>>, %arg6: memref<48x32xbf16, #tpu.memory_space<vmem>>) attributes {dimension_semantics = [#tpu.dimension_semantics<parallel>], iteration_bounds = array<i64: 1>, scalar_prefetch = 0 : i64, scratch_operands = 0 : i64, tpu.core_type = #tpu.core_type<tc>, window_params = [{transform_indices = @transform_0, window_bounds = array<i64: 48, 8>}, {transform_indices = @transform_1, window_bounds = array<i64: 48, 8>}, {transform_indices = @transform_2, window_bounds = array<i64: 48, 32>}, {pipeline_mode = #tpu.pipeline_mode<synchronous>, transform_indices = @transform_3, window_bounds = array<i64: 8, 32>}, {transform_indices = @transform_4, window_bounds = array<i64: 48, 8>}, {transform_indices = @transform_5, window_bounds = array<i64: 48, 32>}]} {
    %c0 = arith.constant 0 : index
    %c0_0 = arith.constant 0 : index
    %0 = vector.load %arg1[%c0, %c0_0] : memref<48x8xf32, #tpu.memory_space<vmem>>, vector<48x8xf32>
    %c0_1 = arith.constant 0 : index
    %c0_2 = arith.constant 0 : index
    %1 = vector.load %arg2[%c0_1, %c0_2] : memref<48x8xf32, #tpu.memory_space<vmem>>, vector<48x8xf32>
    %2 = arith.subf %0, %1 : vector<48x8xf32>
    %3 = math.exp %2 : vector<48x8xf32>
    %4 = arith.truncf %3 : vector<48x8xf32> to vector<48x8xbf16>
    %c0_3 = arith.constant 0 : index
    %c0_4 = arith.constant 0 : index
    %5 = vector.load %arg5[%c0_3, %c0_4] : memref<48x8xbf16, #tpu.memory_space<vmem>>, vector<48x8xbf16>
    tpu.vector_store %arg5[%c0_3, %c0_4], %4 {strides = array<i32>} : memref<48x8xbf16, #tpu.memory_space<vmem>>, vector<48x8xbf16>,
    %6 = arith.truncf %3 : vector<48x8xf32> to vector<48x8xbf16>
    %c0_5 = arith.constant 0 : index
    %c0_6 = arith.constant 0 : index
    %7 = vector.load %arg4[%c0_5, %c0_6] : memref<8x32xbf16, #tpu.memory_space<vmem>>, vector<8x32xbf16>
    %cst = arith.constant dense<0.000000e+00> : vector<48x32xf32>
    %8 = tpu.matmul %6, %7, %cst {dimension_numbers = #tpu.dot_dimension_numbers<[1], [0], [0], [1], [0, 0, 1, 1], [], []>} : vector<48x8xbf16>, vector<8x32xbf16>, vector<48x32xf32> -> vector<48x32xf32>
    %c0_7 = arith.constant 0 : index
    %c0_8 = arith.constant 0 : index
    %9 = vector.load %arg3[%c0_7, %c0_8] : memref<48x32xf32, #tpu.memory_space<vmem>>, vector<48x32xf32>
    %10 = arith.mulf %8, %9 : vector<48x32xf32>
    %11 = arith.truncf %10 : vector<48x32xf32> to vector<48x32xbf16>
    %c0_9 = arith.constant 0 : index
    %c0_10 = arith.constant 0 : index
    %12 = vector.load %arg6[%c0_9, %c0_10] : memref<48x32xbf16, #tpu.memory_space<vmem>>, vector<48x32xbf16>
    tpu.vector_store %arg6[%c0_9, %c0_10], %11 {strides = array<i32>} : memref<48x32xbf16, #tpu.memory_space<vmem>>, vector<48x32xbf16>,
    return
  }
  func.func @transform_0(%arg0: i32) -> (i32, i32) {
    %c0_i32 = arith.constant 0 : i32
    %c0_i32_0 = arith.constant 0 : i32
    return %arg0, %c0_i32 : i32, i32
  }
  func.func @transform_1(%arg0: i32) -> (i32, i32) {
    %c0_i32 = arith.constant 0 : i32
    %c0_i32_0 = arith.constant 0 : i32
    return %arg0, %c0_i32 : i32, i32
  }
  func.func @transform_2(%arg0: i32) -> (i32, i32) {
    %c0_i32 = arith.constant 0 : i32
    %c0_i32_0 = arith.constant 0 : i32
    return %arg0, %c0_i32 : i32, i32
  }
  func.func @transform_3(%arg0: i32) -> (i32, i32) {
    %c0_i32 = arith.constant 0 : i32
    %c0_i32_0 = arith.constant 0 : i32
    %c0_i32_1 = arith.constant 0 : i32
    return %c0_i32, %c0_i32_0 : i32, i32
  }
  func.func @transform_4(%arg0: i32) -> (i32, i32) {
    %c0_i32 = arith.constant 0 : i32
    %c0_i32_0 = arith.constant 0 : i32
    return %arg0, %c0_i32 : i32, i32
  }
  func.func @transform_5(%arg0: i32) -> (i32, i32) {
    %c0_i32 = arith.constant 0 : i32
    %c0_i32_0 = arith.constant 0 : i32
    return %arg0, %c0_i32 : i32, i32
  }
}

module attributes {stable_mosaic.version = 11 : i64} {
  func.func @_edge_kernel(%arg0: i32, %arg1: memref<48x96xbf16, #tpu.memory_space<vmem>>, %arg2: memref<96x32xbf16, #tpu.memory_space<vmem>>, %arg3: memref<1x32xf32, #tpu.memory_space<vmem>>, %arg4: memref<32x8xbf16, #tpu.memory_space<vmem>>, %arg5: memref<64x32xbf16, #tpu.memory_space<vmem>>, %arg6: memref<1x32xf32, #tpu.memory_space<vmem>>, %arg7: memref<48x8xf32, #tpu.memory_space<vmem>>, %arg8: memref<48x32xf32, #tpu.memory_space<vmem>>) attributes {dimension_semantics = [#tpu.dimension_semantics<parallel>], iteration_bounds = array<i64: 1>, scalar_prefetch = 0 : i64, scratch_operands = 0 : i64, tpu.core_type = #tpu.core_type<tc>, window_params = [{transform_indices = @transform_0, window_bounds = array<i64: 48, 96>}, {pipeline_mode = #tpu.pipeline_mode<synchronous>, transform_indices = @transform_1, window_bounds = array<i64: 96, 32>}, {pipeline_mode = #tpu.pipeline_mode<synchronous>, transform_indices = @transform_2, window_bounds = array<i64: 1, 32>}, {pipeline_mode = #tpu.pipeline_mode<synchronous>, transform_indices = @transform_3, window_bounds = array<i64: 32, 8>}, {pipeline_mode = #tpu.pipeline_mode<synchronous>, transform_indices = @transform_4, window_bounds = array<i64: 64, 32>}, {pipeline_mode = #tpu.pipeline_mode<synchronous>, transform_indices = @transform_5, window_bounds = array<i64: 1, 32>}, {transform_indices = @transform_6, window_bounds = array<i64: 48, 8>}, {transform_indices = @transform_7, window_bounds = array<i64: 48, 32>}]} {
    %c0 = arith.constant 0 : index
    %c0_0 = arith.constant 0 : index
    %0 = vector.load %arg1[%c0, %c0_0] : memref<48x96xbf16, #tpu.memory_space<vmem>>, vector<48x96xbf16>
    %c0_1 = arith.constant 0 : index
    %c0_2 = arith.constant 0 : index
    %1 = vector.load %arg2[%c0_1, %c0_2] : memref<96x32xbf16, #tpu.memory_space<vmem>>, vector<96x32xbf16>
    %cst = arith.constant dense<0.000000e+00> : vector<48x32xf32>
    %2 = tpu.matmul %0, %1, %cst {dimension_numbers = #tpu.dot_dimension_numbers<[1], [0], [0], [1], [0, 0, 1, 1], [], []>} : vector<48x96xbf16>, vector<96x32xbf16>, vector<48x32xf32> -> vector<48x32xf32>
    %c0_3 = arith.constant 0 : index
    %c0_4 = arith.constant 0 : index
    %3 = vector.load %arg3[%c0_3, %c0_4] : memref<1x32xf32, #tpu.memory_space<vmem>>, vector<1x32xf32>
    %4 = vector.broadcast %3 : vector<1x32xf32> to vector<48x32xf32>
    %5 = arith.addf %2, %4 : vector<48x32xf32>
    %cst_5 = arith.constant 0.000000e+00 : f32
    %6 = vector.broadcast %cst_5 : f32 to vector<48x32xf32>
    %7 = arith.cmpf ogt, %5, %6 : vector<48x32xf32>
    %cst_6 = arith.constant 2.000000e-01 : f32
    %8 = vector.broadcast %cst_6 : f32 to vector<48x32xf32>
    %9 = arith.mulf %8, %5 : vector<48x32xf32>
    %10 = arith.select %7, %5, %9 : vector<48x32xi1>, vector<48x32xf32>
    %11 = arith.truncf %10 : vector<48x32xf32> to vector<48x32xbf16>
    %c0_7 = arith.constant 0 : index
    %c0_8 = arith.constant 0 : index
    %12 = vector.load %arg4[%c0_7, %c0_8] : memref<32x8xbf16, #tpu.memory_space<vmem>>, vector<32x8xbf16>
    %cst_9 = arith.constant dense<0.000000e+00> : vector<48x8xf32>
    %13 = tpu.matmul %11, %12, %cst_9 {dimension_numbers = #tpu.dot_dimension_numbers<[1], [0], [0], [1], [0, 0, 1, 1], [], []>} : vector<48x32xbf16>, vector<32x8xbf16>, vector<48x8xf32> -> vector<48x8xf32>
    %c0_10 = arith.constant 0 : index
    %c0_11 = arith.constant 0 : index
    %14 = vector.load %arg7[%c0_10, %c0_11] : memref<48x8xf32, #tpu.memory_space<vmem>>, vector<48x8xf32>
    tpu.vector_store %arg7[%c0_10, %c0_11], %13 {strides = array<i32>} : memref<48x8xf32, #tpu.memory_space<vmem>>, vector<48x8xf32>,
    %15 = vector.extract_strided_slice %0 {offsets = [0, 0], sizes = [48, 64], strides = [1, 1]} : vector<48x96xbf16> to vector<48x64xbf16>
    %c0_12 = arith.constant 0 : index
    %c0_13 = arith.constant 0 : index
    %16 = vector.load %arg5[%c0_12, %c0_13] : memref<64x32xbf16, #tpu.memory_space<vmem>>, vector<64x32xbf16>
    %cst_14 = arith.constant dense<0.000000e+00> : vector<48x32xf32>
    %17 = tpu.matmul %15, %16, %cst_14 {dimension_numbers = #tpu.dot_dimension_numbers<[1], [0], [0], [1], [0, 0, 1, 1], [], []>} : vector<48x64xbf16>, vector<64x32xbf16>, vector<48x32xf32> -> vector<48x32xf32>
    %c0_15 = arith.constant 0 : index
    %c0_16 = arith.constant 0 : index
    %18 = vector.load %arg6[%c0_15, %c0_16] : memref<1x32xf32, #tpu.memory_space<vmem>>, vector<1x32xf32>
    %19 = vector.broadcast %18 : vector<1x32xf32> to vector<48x32xf32>
    %20 = arith.addf %17, %19 : vector<48x32xf32>
    %c0_17 = arith.constant 0 : index
    %c0_18 = arith.constant 0 : index
    %21 = vector.load %arg8[%c0_17, %c0_18] : memref<48x32xf32, #tpu.memory_space<vmem>>, vector<48x32xf32>
    tpu.vector_store %arg8[%c0_17, %c0_18], %20 {strides = array<i32>} : memref<48x32xf32, #tpu.memory_space<vmem>>, vector<48x32xf32>,
    return
  }
  func.func @transform_0(%arg0: i32) -> (i32, i32) {
    %c0_i32 = arith.constant 0 : i32
    %c0_i32_0 = arith.constant 0 : i32
    return %arg0, %c0_i32 : i32, i32
  }
  func.func @transform_1(%arg0: i32) -> (i32, i32) {
    %c0_i32 = arith.constant 0 : i32
    %c0_i32_0 = arith.constant 0 : i32
    %c0_i32_1 = arith.constant 0 : i32
    return %c0_i32, %c0_i32_0 : i32, i32
  }
  func.func @transform_2(%arg0: i32) -> (i32, i32) {
    %c0_i32 = arith.constant 0 : i32
    %c0_i32_0 = arith.constant 0 : i32
    %c0_i32_1 = arith.constant 0 : i32
    return %c0_i32, %c0_i32_0 : i32, i32
  }
  func.func @transform_3(%arg0: i32) -> (i32, i32) {
    %c0_i32 = arith.constant 0 : i32
    %c0_i32_0 = arith.constant 0 : i32
    %c0_i32_1 = arith.constant 0 : i32
    return %c0_i32, %c0_i32_0 : i32, i32
  }
  func.func @transform_4(%arg0: i32) -> (i32, i32) {
    %c0_i32 = arith.constant 0 : i32
    %c0_i32_0 = arith.constant 0 : i32
    %c0_i32_1 = arith.constant 0 : i32
    return %c0_i32, %c0_i32_0 : i32, i32
  }
  func.func @transform_5(%arg0: i32) -> (i32, i32) {
    %c0_i32 = arith.constant 0 : i32
    %c0_i32_0 = arith.constant 0 : i32
    %c0_i32_1 = arith.constant 0 : i32
    return %c0_i32, %c0_i32_0 : i32, i32
  }
  func.func @transform_6(%arg0: i32) -> (i32, i32) {
    %c0_i32 = arith.constant 0 : i32
    %c0_i32_0 = arith.constant 0 : i32
    return %arg0, %c0_i32 : i32, i32
  }
  func.func @transform_7(%arg0: i32) -> (i32, i32) {
    %c0_i32 = arith.constant 0 : i32
    %c0_i32_0 = arith.constant 0 : i32
    return %arg0, %c0_i32 : i32, i32
  }
}

module attributes {stable_mosaic.version = 11 : i64} {
  func.func @_aggregate_kernel(%arg0: i32, %arg1: i32, %arg2: memref<1x48xi32, #tpu.memory_space<vmem>>, %arg3: memref<48x8xbf16, #tpu.memory_space<vmem>>, %arg4: memref<48x32xbf16, #tpu.memory_space<vmem>>, %arg5: memref<16x32xbf16, #tpu.memory_space<vmem>>, %arg6: memref<32x32xbf16, #tpu.memory_space<vmem>>, %arg7: memref<1x32xf32, #tpu.memory_space<vmem>>, %arg8: memref<8x32xf32, #tpu.memory_space<vmem>>, %arg9: memref<16x32xf32, #tpu.memory_space<vmem>>, %arg10: memref<16x8xf32, #tpu.memory_space<vmem>>, %arg11: memref<16x32xf32, #tpu.memory_space<vmem>>) attributes {dimension_semantics = [#tpu.dimension_semantics<parallel>, #tpu.dimension_semantics<arbitrary>], iteration_bounds = array<i64: 1, 1>, scalar_prefetch = 0 : i64, scratch_operands = 2 : i64, tpu.core_type = #tpu.core_type<tc>, window_params = [{transform_indices = @transform_0, window_bounds = array<i64: 1, 48>}, {transform_indices = @transform_1, window_bounds = array<i64: 48, 8>}, {transform_indices = @transform_2, window_bounds = array<i64: 48, 32>}, {transform_indices = @transform_3, window_bounds = array<i64: 16, 32>}, {pipeline_mode = #tpu.pipeline_mode<synchronous>, transform_indices = @transform_4, window_bounds = array<i64: 32, 32>}, {pipeline_mode = #tpu.pipeline_mode<synchronous>, transform_indices = @transform_5, window_bounds = array<i64: 1, 32>}, {pipeline_mode = #tpu.pipeline_mode<synchronous>, transform_indices = @transform_6, window_bounds = array<i64: 8, 32>}, {transform_indices = @transform_7, window_bounds = array<i64: 16, 32>}]} {
    %c0_i32 = arith.constant 0 : i32
    %0 = arith.cmpi eq, %arg1, %c0_i32 : i32
    %1 = arith.extui %0 : i1 to i32
    %c0_i32_0 = arith.constant 0 : i32
    %2 = arith.cmpi ne, %1, %c0_i32_0 : i32
    scf.if %2 {
      %cst_19 = arith.constant 0.000000e+00 : f32
      %27 = vector.broadcast %cst_19 : f32 to vector<16x8xf32>
      %c0_20 = arith.constant 0 : index
      %c0_21 = arith.constant 0 : index
      %28 = vector.load %arg10[%c0_20, %c0_21] : memref<16x8xf32, #tpu.memory_space<vmem>>, vector<16x8xf32>
      tpu.vector_store %arg10[%c0_20, %c0_21], %27 {strides = array<i32>} : memref<16x8xf32, #tpu.memory_space<vmem>>, vector<16x8xf32>,
      %cst_22 = arith.constant 0.000000e+00 : f32
      %29 = vector.broadcast %cst_22 : f32 to vector<16x32xf32>
      %c0_23 = arith.constant 0 : index
      %c0_24 = arith.constant 0 : index
      %30 = vector.load %arg11[%c0_23, %c0_24] : memref<16x32xf32, #tpu.memory_space<vmem>>, vector<16x32xf32>
      tpu.vector_store %arg11[%c0_23, %c0_24], %29 {strides = array<i32>} : memref<16x32xf32, #tpu.memory_space<vmem>>, vector<16x32xf32>,
    } else {
    }
    %c16_i32 = arith.constant 16 : i32
    %3 = arith.muli %arg0, %c16_i32 : i32
    %4 = tpu.iota {dimensions = array<i32: 0>} : vector<16x48xi32>
    %5 = vector.broadcast %3 : i32 to vector<16x48xi32>
    %6 = arith.addi %5, %4 : vector<16x48xi32>
    %c0 = arith.constant 0 : index
    %c0_1 = arith.constant 0 : index
    %7 = vector.load %arg2[%c0, %c0_1] : memref<1x48xi32, #tpu.memory_space<vmem>>, vector<1x48xi32>
    %8 = vector.broadcast %7 : vector<1x48xi32> to vector<16x48xi32>
    %9 = arith.cmpi eq, %8, %6 : vector<16x48xi32>
    %cst = arith.constant 1.000000e+00 : f32
    %cst_2 = arith.constant 0.000000e+00 : f32
    %10 = vector.broadcast %cst : f32 to vector<16x48xf32>
    %11 = vector.broadcast %cst_2 : f32 to vector<16x48xf32>
    %12 = arith.select %9, %10, %11 : vector<16x48xi1>, vector<16x48xf32>
    %13 = arith.truncf %12 : vector<16x48xf32> to vector<16x48xbf16>
    %c0_3 = arith.constant 0 : index
    %c0_4 = arith.constant 0 : index
    %14 = vector.load %arg10[%c0_3, %c0_4] : memref<16x8xf32, #tpu.memory_space<vmem>>, vector<16x8xf32>
    %c0_5 = arith.constant 0 : index
    %c0_6 = arith.constant 0 : index
    %15 = vector.load %arg3[%c0_5, %c0_6] : memref<48x8xbf16, #tpu.memory_space<vmem>>, vector<48x8xbf16>
    %cst_7 = arith.constant dense<0.000000e+00> : vector<16x8xf32>
    %16 = tpu.matmul %13, %15, %cst_7 {dimension_numbers = #tpu.dot_dimension_numbers<[1], [0], [0], [1], [0, 0, 1, 1], [], []>} : vector<16x48xbf16>, vector<48x8xbf16>, vector<16x8xf32> -> vector<16x8xf32>
    %17 = arith.addf %14, %16 : vector<16x8xf32>
    %c0_8 = arith.constant 0 : index
    %c0_9 = arith.constant 0 : index
    %18 = vector.load %arg10[%c0_8, %c0_9] : memref<16x8xf32, #tpu.memory_space<vmem>>, vector<16x8xf32>
    tpu.vector_store %arg10[%c0_8, %c0_9], %17 {strides = array<i32>} : memref<16x8xf32, #tpu.memory_space<vmem>>, vector<16x8xf32>,
    %c0_10 = arith.constant 0 : index
    %c0_11 = arith.constant 0 : index
    %19 = vector.load %arg11[%c0_10, %c0_11] : memref<16x32xf32, #tpu.memory_space<vmem>>, vector<16x32xf32>
    %c0_12 = arith.constant 0 : index
    %c0_13 = arith.constant 0 : index
    %20 = vector.load %arg4[%c0_12, %c0_13] : memref<48x32xbf16, #tpu.memory_space<vmem>>, vector<48x32xbf16>
    %cst_14 = arith.constant dense<0.000000e+00> : vector<16x32xf32>
    %21 = tpu.matmul %13, %20, %cst_14 {dimension_numbers = #tpu.dot_dimension_numbers<[1], [0], [0], [1], [0, 0, 1, 1], [], []>} : vector<16x48xbf16>, vector<48x32xbf16>, vector<16x32xf32> -> vector<16x32xf32>
    %22 = arith.addf %19, %21 : vector<16x32xf32>
    %c0_15 = arith.constant 0 : index
    %c0_16 = arith.constant 0 : index
    %23 = vector.load %arg11[%c0_15, %c0_16] : memref<16x32xf32, #tpu.memory_space<vmem>>, vector<16x32xf32>
    tpu.vector_store %arg11[%c0_15, %c0_16], %22 {strides = array<i32>} : memref<16x32xf32, #tpu.memory_space<vmem>>, vector<16x32xf32>,
    %c0_i32_17 = arith.constant 0 : i32
    %24 = arith.cmpi eq, %arg1, %c0_i32_17 : i32
    %25 = arith.extui %24 : i1 to i32
    %c0_i32_18 = arith.constant 0 : i32
    %26 = arith.cmpi ne, %25, %c0_i32_18 : i32
    scf.if %26 {
      %c0_19 = arith.constant 0 : index
      %c0_20 = arith.constant 0 : index
      %27 = vector.load %arg10[%c0_19, %c0_20] : memref<16x8xf32, #tpu.memory_space<vmem>>, vector<16x8xf32>
      %c0_21 = arith.constant 0 : index
      %c0_22 = arith.constant 0 : index
      %28 = vector.load %arg8[%c0_21, %c0_22] : memref<8x32xf32, #tpu.memory_space<vmem>>, vector<8x32xf32>
      %cst_23 = arith.constant dense<0.000000e+00> : vector<16x32xf32>
      %29 = tpu.matmul %27, %28, %cst_23 {dimension_numbers = #tpu.dot_dimension_numbers<[1], [0], [0], [1], [0, 0, 1, 1], [], []>} : vector<16x8xf32>, vector<8x32xf32>, vector<16x32xf32> -> vector<16x32xf32>
      %cst_24 = arith.constant 1.000000e-16 : f32
      %30 = vector.broadcast %cst_24 : f32 to vector<16x32xf32>
      %31 = arith.addf %29, %30 : vector<16x32xf32>
      %32 = tpu.reciprocal %31 {approx = true} : vector<16x32xf32> -> vector<16x32xf32>
      %c0_25 = arith.constant 0 : index
      %c0_26 = arith.constant 0 : index
      %33 = vector.load %arg5[%c0_25, %c0_26] : memref<16x32xbf16, #tpu.memory_space<vmem>>, vector<16x32xbf16>
      %c0_27 = arith.constant 0 : index
      %c0_28 = arith.constant 0 : index
      %34 = vector.load %arg6[%c0_27, %c0_28] : memref<32x32xbf16, #tpu.memory_space<vmem>>, vector<32x32xbf16>
      %cst_29 = arith.constant dense<0.000000e+00> : vector<16x32xf32>
      %35 = tpu.matmul %33, %34, %cst_29 {dimension_numbers = #tpu.dot_dimension_numbers<[1], [0], [0], [1], [0, 0, 1, 1], [], []>} : vector<16x32xbf16>, vector<32x32xbf16>, vector<16x32xf32> -> vector<16x32xf32>
      %c0_30 = arith.constant 0 : index
      %c0_31 = arith.constant 0 : index
      %36 = vector.load %arg7[%c0_30, %c0_31] : memref<1x32xf32, #tpu.memory_space<vmem>>, vector<1x32xf32>
      %37 = vector.broadcast %36 : vector<1x32xf32> to vector<16x32xf32>
      %38 = arith.addf %35, %37 : vector<16x32xf32>
      %c0_32 = arith.constant 0 : index
      %c0_33 = arith.constant 0 : index
      %39 = vector.load %arg11[%c0_32, %c0_33] : memref<16x32xf32, #tpu.memory_space<vmem>>, vector<16x32xf32>
      %40 = arith.mulf %39, %32 : vector<16x32xf32>
      %41 = arith.addf %40, %38 : vector<16x32xf32>
      %cst_34 = arith.constant 0.000000e+00 : f32
      %42 = vector.broadcast %cst_34 : f32 to vector<16x32xf32>
      %43 = arith.maximumf %41, %42 : vector<16x32xf32>
      %c0_35 = arith.constant 0 : index
      %c0_36 = arith.constant 0 : index
      %44 = vector.load %arg9[%c0_35, %c0_36] : memref<16x32xf32, #tpu.memory_space<vmem>>, vector<16x32xf32>
      tpu.vector_store %arg9[%c0_35, %c0_36], %43 {strides = array<i32>} : memref<16x32xf32, #tpu.memory_space<vmem>>, vector<16x32xf32>,
    } else {
    }
    return
  }
  func.func @transform_0(%arg0: i32, %arg1: i32) -> (i32, i32) {
    %c0_i32 = arith.constant 0 : i32
    %c0_i32_0 = arith.constant 0 : i32
    return %c0_i32, %arg1 : i32, i32
  }
  func.func @transform_1(%arg0: i32, %arg1: i32) -> (i32, i32) {
    %c0_i32 = arith.constant 0 : i32
    %c0_i32_0 = arith.constant 0 : i32
    return %arg1, %c0_i32 : i32, i32
  }
  func.func @transform_2(%arg0: i32, %arg1: i32) -> (i32, i32) {
    %c0_i32 = arith.constant 0 : i32
    %c0_i32_0 = arith.constant 0 : i32
    return %arg1, %c0_i32 : i32, i32
  }
  func.func @transform_3(%arg0: i32, %arg1: i32) -> (i32, i32) {
    %c0_i32 = arith.constant 0 : i32
    %c0_i32_0 = arith.constant 0 : i32
    return %arg0, %c0_i32 : i32, i32
  }
  func.func @transform_4(%arg0: i32, %arg1: i32) -> (i32, i32) {
    %c0_i32 = arith.constant 0 : i32
    %c0_i32_0 = arith.constant 0 : i32
    %c0_i32_1 = arith.constant 0 : i32
    return %c0_i32, %c0_i32_0 : i32, i32
  }
  func.func @transform_5(%arg0: i32, %arg1: i32) -> (i32, i32) {
    %c0_i32 = arith.constant 0 : i32
    %c0_i32_0 = arith.constant 0 : i32
    %c0_i32_1 = arith.constant 0 : i32
    return %c0_i32, %c0_i32_0 : i32, i32
  }
  func.func @transform_6(%arg0: i32, %arg1: i32) -> (i32, i32) {
    %c0_i32 = arith.constant 0 : i32
    %c0_i32_0 = arith.constant 0 : i32
    %c0_i32_1 = arith.constant 0 : i32
    return %c0_i32, %c0_i32_0 : i32, i32
  }
  func.func @transform_7(%arg0: i32, %arg1: i32) -> (i32, i32) {
    %c0_i32 = arith.constant 0 : i32
    %c0_i32_0 = arith.constant 0 : i32
    return %arg0, %c0_i32 : i32, i32
  }
}

</mosaic_0001>

<bundles_post_ra>
// kernel: ingram_forward.13
= control target key start
LH: loop header
LB: loop body
LE: loop exit
PB: predicated region body
PF: predicated region fallthrough
CT: control target
= control target key end

     0   :  { %vm46_vm0 = vcmask 1043456   ;;  %v137_v0 = vmov 0.0   ;;  %vm138_vm1 = vmmov 0   ;;  %vm38_vm2 = vcmask 60416   ;;  %s202_s3 = inlined_call_operand.vmem [shape: bf16[8,32], index: 3, kind: input, shape index: {}]   ;;  %s203_s0 = inlined_call_operand.vmem [shape: f32[16,8], index: 0, kind: input, shape index: {}]   ;;  %s204_s1 = inlined_call_operand.vmem [shape: f32[16,8], index: 1, kind: input, shape index: {}]   ;;  %s205_s4 = inlined_call_operand.vmem [shape: bf16[16,8], index: 4, kind: output, shape index: {0}]   ;;  %s206_s2 = inlined_call_operand.vmem [shape: f32[16,32], index: 2, kind: input, shape index: {}]   ;;  %s207_s5 = inlined_call_operand.vmem [shape: bf16[16,32], index: 5, kind: output, shape index: {1}]  }
   0x1   :  { %125 = vmatprep.subr.bf16.mxu0 %v137_v0  ;;  %v41_v1 = vld [vmem:[%s202_s3] sm:$0xf]  ;;  %127 = vmatprep.mubr.msk.bf16.mxu0 %vm138_vm1, %v137_v0  ;;  %v21_v3 = vld [vmem:[%s203_s0 + $0x8] sm:$0xff]  ;;  %vm42_vm3 = vcmask 64512   ;;  %vm103_vm4 = vcmask 257024  }
   0x2   :  { %v20_v2 = vld [vmem:[%s203_s0] sm:$0xff]  ;;  %v48_v4 = vsel %vm46_vm0, %v41_v1, 0  ;;  %v23_v6 = vld [vmem:[%s204_s1 + $0x8] sm:$0xff] }
   0x3   :  { %v22_v5 = vld [vmem:[%s204_s1] sm:$0xff]  ;;  %126 = vmatpush3.bf16.msra.mxu0 %v48_v4  ;;  %v25_v8 = vsub.f32 %v21_v3, %v23_v6  ;;  %v92_v18 = vld [vmem:[%s206_s2 + $0x8] sm:$0xff] }
   0x4   :  { %v24_v7 = vsub.f32 %v20_v2, %v22_v5  ;;  %v91_v16 = vld [vmem:[%s206_s2] sm:$0xff] }
   0x5   :  { %v28_v10 = vmul.f32 1.442695, %v25_v8 }
   0x6   :  { %v26_v9 = vmul.f32 1.442695, %v24_v7 }
   0x8   :  { %133 = vpow2.f32 %v26_v9 }
   0x9   :  { %135 = vpow2.f32 %v28_v10 }
  0x12   :  { %v134_v11 = vpop.eup %133 }
  0x13   :  { %v136_v12 = vpop.eup %135  ;;  %v119_v13 = vpack.c.bf16 %v134_v11, %v134_v11 }
  0x14   :  { %v30_v14 = vpack.c.bf16 %v136_v12, %v134_v11  ;;  %v120_v15 = vpack.c.bf16 %v136_v12, %v136_v12 }
  0x15   :  { %39 = vst.msk [vmem:[%s205_s4] sm:$0xf] %vm38_vm2, %v119_v13 }
  0x16   :  { %40 = vst.msk [vmem:[%s205_s4 + $0x4] sm:$0xf] %vm38_vm2, %v120_v15  ;;  %128 = vmatmul.mubr.msk.bf16.vlgmr.msra.gmra.mrb[0].mxu0 %vm42_vm3, %v30_v14 }
  0xe9   :  { %v84_v17 = vpop.f32.mrb[0].mxu0 }
  0xea   :  { %v93_v19 = vmul.f32 %v91_v16, %v84_v17  ;;  %v129_v20 = vpop.f32.mrb[1].mxu0 }
  0xeb   :  { %v87_v21 = vpop.f32.mrb[2].mxu0 }
  0xec   :  { %v121_v22 = vpack.c.bf16 %v93_v19, %v93_v19  ;;  %v94_v23 = vmul.f32 %v92_v18, %v87_v21  ;;  %v130_v24 = vpop.f32.mrb[3].mxu0 }
  0xee   :  { %104 = vst.msk [vmem:[%s207_s5] sm:$0xf] %vm103_vm4, %v121_v22  ;;  %v122_v25 = vpack.c.bf16 %v94_v23, %v94_v23 }
  0xf0   :  { %105 = vst.msk [vmem:[%s207_s5 + $0x4] sm:$0xf] %vm103_vm4, %v122_v25 }

// kernel: ingram_forward.12
= control target key start
LH: loop header
LB: loop body
LE: loop exit
PB: predicated region body
PF: predicated region fallthrough
CT: control target
= control target key end

     0   :  { %v333_v0 = vmov 0.0   ;;  %vm334_vm0 = vmmov 0   ;;  %vm75_vm1 = vcmask 523264   ;;  %vm145_vm4 = vcmask 261120   ;;  %s438_s2 = inlined_call_operand.vmem [shape: bf16[64,32], index: 2, kind: input, shape index: {}]   ;;  %s439_s0 = inlined_call_operand.vmem [shape: bf16[16,64], index: 0, kind: input, shape index: {}]   ;;  %s440_s4 = inlined_call_operand.vmem [shape: bf16[32,8], index: 4, kind: input, shape index: {}]   ;;  %s441_s5 = inlined_call_operand.vmem [shape: bf16[32,32], index: 5, kind: input, shape index: {}]   ;;  %s442_s3 = inlined_call_operand.vmem [shape: f32[1,32], index: 3, kind: input, shape index: {}]   ;;  %s443_s1 = inlined_call_operand.vmem [shape: f32[16,8], index: 1, kind: input, shape index: {}]   ;;  %s444_s7 = inlined_call_operand.vmem [shape: f32[16,8], index: 7, kind: output, shape index: {0}]   ;;  %s445_s6 = inlined_call_operand.vmem [shape: f32[1,32], index: 6, kind: input, shape index: {}]   ;;  %s446_s8 = inlined_call_operand.vmem [shape: f32[16,32], index: 8, kind: output, shape index: {1}]  }
   0x1   :  { %294 = vmatprep.subr.bf16.mxu0 %v333_v0  ;;  %v324_v1 = vld [vmem:[%s438_s2] sm:$0xff]   ;;  %302 = vmatprep.mubr.msk.bf16.mxu0 %vm334_vm0, %v333_v0  ;;  %v325_v2 = vld [vmem:[%s438_s2 + $0x8] sm:$0xff]   ;;  %v326_v3 = vld [vmem:[%s438_s2 + $0x10] sm:$0xff]   ;;  %vm190_vm5 = vcmask 64512  }
   0x2   :  { %306 = vmatprep.subr.bf16.mxu1 %v333_v0  ;;  %310 = vmatprep.mubr.msk.bf16.mxu1 %vm334_vm0, %v333_v0  ;;  %v327_v4 = vld [vmem:[%s438_s2 + $0x18] sm:$0xff]   ;;  %v328_v5 = vld [vmem:[%s439_s0] sm:$0xff]   ;;  %v330_v7 = vld [vmem:[%s440_s4 + $0x8] sm:$0xff]  }
   0x3   :  { %295 = vmatpush3.bf16.msra.mxu0 %v324_v1  ;;  %v329_v6 = vld [vmem:[%s440_s4] sm:$0xff]   ;;  %v332_v21 = vld [vmem:[%s441_s5 + $0x8] sm:$0xff]  }
   0x4   :  { %296 = vmatprep.subr.bf16.mxu0 %v333_v0  ;;  %307 = vmatpush3.bf16.msra.mxu1 %v329_v6  ;;  %v269_v8 = vld [vmem:[%s442_s3] ss:$0 sm:$0xff]  ;;  %v132_v24 = vld [vmem:[%s443_s1 + $0x8] sm:$0xff] }
   0x5   :  { %308 = vmatprep.subr.bf16.mxu1 %v333_v0  ;;  %v331_v19 = vld [vmem:[%s441_s5] sm:$0xff]  }
   0x6   :  { %v131_v22 = vld [vmem:[%s443_s1] sm:$0xff] }
   0x7   :  { %297 = vmatpush3.bf16.msra.mxu0 %v325_v2  ;;  %v279_v30 = vld [vmem:[%s445_s6] ss:$0 sm:$0xff] }
   0x8   :  { %298 = vmatprep.subr.bf16.mxu0 %v333_v0  ;;  %309 = vmatpush3.bf16.msra.mxu1 %v330_v7 }
   0x9   :  { %314 = vmatprep.subr.bf16.mxu1 %v333_v0 }
   0xb   :  { %299 = vmatpush3.bf16.msra.mxu0 %v326_v3 }
   0xc   :  { %300 = vmatprep.subr.bf16.mxu0 %v333_v0 }
   0xf   :  { %301 = vmatpush3.bf16.msra.mxu0 %v327_v4 }
  0x12   :  { %303 = vmatmul.mubr.msk.bf16.vlgmr.msra.gmra.mrb[0].mxu0 %vm75_vm1, %v328_v5 }
  0xe5   :  { %v113_v9 = vpop.f32.mrb[0].mxu0 }
  0xe6   :  { %v114_v10 = vadd.f32 %v269_v8, %v113_v9  ;;  %v304_v11 = vpop.f32.mrb[1].mxu0 }
  0xe7   :  { %v116_v12 = vpop.f32.mrb[2].mxu0 }
  0xe8   :  { %v122_v13 = vmul.f32 0.2, %v114_v10  ;;  %v117_v14 = vadd.f32 %v269_v8, %v116_v12  ;;  %v305_v15 = vpop.f32.mrb[3].mxu0  ;;  %vm120_vm2 = vcmp.gt.f32.partialorder %v114_v10, 0.0 }
  0xea   :  { %vm121_vm3 = vcmp.gt.f32.partialorder %v117_v14, 0.0  ;;  %v123_v16 = vmul.f32 0.2, %v117_v14  ;;  %v124_v17 = vsel %vm120_vm2, %v114_v10, %v122_v13 }
  0xec   :  { %v125_v18 = vsel %vm121_vm3, %v117_v14, %v123_v16 }
  0xed   :  { %v126_v20 = vpack.c.bf16 %v125_v18, %v124_v17 }
  0xef   :  { %311 = vmatmul.mubr.msk.bf16.vlgmr.msra.gmra.mrb[0].mxu1 %vm145_vm4, %v126_v20 }
  0xf0   :  { %315 = vmatpush3.bf16.msra.mxu1 %v331_v19  ;;  %318 = vmatprep.mubr.msk.bf16.mxu1 %vm334_vm0, %v333_v0 }
  0xf1   :  { %316 = vmatprep.subr.bf16.mxu1 %v333_v0 }
  0xf4   :  { %317 = vmatpush3.bf16.msra.mxu1 %v332_v21 }
  0xf7   :  { %319 = vmatmul.mubr.msk.bf16.vlgmr.msra.gmra.mrb[4].mxu1 %vm145_vm4, %v328_v5 }
 0x1c2   :  { %v183_v23 = vpop.f32.mrb[0].mxu1 }
 0x1c3   :  { %v184_v25 = vadd.f32 %v183_v23, %v131_v22  ;;  %v312_v26 = vpop.f32.mrb[1].mxu1 }
 0x1c4   :  { %v186_v27 = vpop.f32.mrb[2].mxu1 }
 0x1c5   :  { %191 = vst.msk [vmem:[%s444_s7] sm:$0xff] %vm190_vm5, %v184_v25  ;;  %v187_v28 = vadd.f32 %v186_v27, %v132_v24  ;;  %v313_v29 = vpop.f32.mrb[3].mxu1 }
 0x1c7   :  { %192 = vst.msk [vmem:[%s444_s7 + $0x8] sm:$0xff] %vm190_vm5, %v187_v28 }
 0x1ca   :  { %v252_v31 = vpop.f32.mrb[4].mxu1 }
 0x1cb   :  { %v253_v32 = vadd.f32 %v279_v30, %v252_v31  ;;  %v320_v33 = vpop.f32.mrb[5].mxu1 }
 0x1cc   :  { %v255_v34 = vpop.f32.mrb[6].mxu1 }
 0x1cd   :  { %259 = vst.msk [vmem:[%s446_s8] sm:$0xff] %vm145_vm4, %v253_v32  ;;  %v256_v35 = vadd.f32 %v279_v30, %v255_v34  ;;  %v321_v36 = vpop.f32.mrb[7].mxu1 }
 0x1cf   :  { %260 = vst.msk [vmem:[%s446_s8 + $0x8] sm:$0xff] %vm145_vm4, %v256_v35 }

// kernel: ingram_forward.14
= control target key start
LH: loop header
LB: loop body
LE: loop exit
PB: predicated region body
PF: predicated region fallthrough
CT: control target
= control target key end

     0   :  { %v38_v0 = vlaneseq  ;;  %v405_v1 = vmov 0.0   ;;  %vm406_vm0 = vmmov 0   ;;  %vm31_vm1 = vcmask 64512   ;;  %s493_s1 = inlined_call_operand.vmem [shape: bf16[16,8], index: 1, kind: input, shape index: {}]   ;;  %s494_s0 = inlined_call_operand.vmem [shape: s32[1,16], index: 0, kind: input, shape index: {}]   ;;  %s495_s6 = inlined_call_operand.vmem [shape: f32[8,32], index: 6, kind: input, shape index: {}]   ;;  %s496_s2 = inlined_call_operand.vmem [shape: bf16[16,32], index: 2, kind: input, shape index: {}]   ;;  %s497_s4 = inlined_call_operand.vmem [shape: bf16[32,32], index: 4, kind: input, shape index: {}]   ;;  %s498_s3 = inlined_call_operand.vmem [shape: bf16[16,32], index: 3, kind: input, shape index: {}]   ;;  %s499_s5 = inlined_call_operand.vmem [shape: f32[1,32], index: 5, kind: input, shape index: {}]   ;;  %s500_s7 = inlined_call_operand.vmem [shape: f32[16,32], index: 7, kind: output, shape index: {}]  }
   0x1   :  { %369 = vmatprep.subr.bf16.mxu0 %v405_v1  ;;  %v396_v2 = vld [vmem:[%s493_s1] sm:$0xff]   ;;  %371 = vmatprep.mubr.msk.bf16.mxu0 %vm406_vm0, %v405_v1  ;;  %32 = vst.msk [vmem:[#allocation2] sm:$0xff] %vm31_vm1, %v405_v1  ;;  %33 = vst.msk [vmem:[#allocation2 + $0x8] sm:$0xff] %vm31_vm1, %v405_v1  ;;  %vm64_vm4 = vcmask 130048   ;;  %vm34_vm5 = vcmask 261120   ;;  %v399_v12 = vld [vmem:[%s497_s4 + $0x8] sm:$0xff]  }
   0x2   :  { %v39_v3 = vshrl.u32 %v38_v0, 7  ;;  %v347_v4 = vld [vmem:[%s494_s0] ss:$0 sm:$0xff]  ;;  %375 = vmatprep.subr.bf16.mxu1 %v405_v1  ;;  %377 = vmatprep.mubr.msk.bf16.mxu1 %vm406_vm0, %v405_v1  ;;  %35 = vst.msk [vmem:[#allocation3] sm:$0xff] %vm34_vm5, %v405_v1  ;;  %36 = vst.msk [vmem:[#allocation3 + $0x8] sm:$0xff] %vm34_vm5, %v405_v1 }
   0x3   :  { %370 = vmatpush3.bf16.msra.mxu0 %v396_v2  ;;  %v175_v9 = vld [vmem:[%s495_s6] sm:$0xff] }
   0x4   :  { %v40_v5 = vadd.s32 8, %v39_v3  ;;  %vm49_vm2 = vcmp.eq.s32.totalorder %v347_v4, %v39_v3  ;;  %381 = vmatprep.subr.mxu0 %v175_v9  ;;  %v397_v10 = vld [vmem:[%s496_s2] sm:$0xff]  }
   0x5   :  { %v51_v6 = vsel %vm49_vm2, 1.0, %v405_v1  ;;  %376 = vmatpush3.bf16.msra.mxu1 %v397_v10  ;;  %v398_v11 = vld [vmem:[%s497_s4] sm:$0xff]  }
   0x6   :  { %vm50_vm3 = vcmp.eq.s32.totalorder %v347_v4, %v40_v5  ;;  %386 = vmatprep.subr.bf16.mxu1 %v405_v1  ;;  %v400_v13 = vld [vmem:[%s498_s3] sm:$0xff]  }
   0x7   :  { %v52_v7 = vsel %vm50_vm3, 1.0, %v405_v1  ;;  %v354_v40 = vld [vmem:[%s499_s5] ss:$0 sm:$0xff] }
   0x8   :  { %v53_v8 = vpack.c.bf16 %v52_v7, %v51_v6  ;;  %v54_v14 = vld [vmem:[#allocation2] sm:$0xff]  ;;  %v55_v16 = vld [vmem:[#allocation2 + $0x8] sm:$0xff] }
   0x9   :  { %v114_v24 = vld [vmem:[#allocation3] sm:$0xff]  ;;  %v115_v29 = vld [vmem:[#allocation3 + $0x8] sm:$0xff] }
   0xa   :  { %372 = vmatmul.mubr.msk.bf16.vlgmr.msra.gmra.mrb[0].mxu0 %vm64_vm4, %v53_v8  ;;  %378 = vmatmul.mubr.msk.bf16.vlgmr.msra.gmra.mrb[0].mxu1 %vm64_vm4, %v53_v8 }
   0xb   :  { %382 = vmatpush3.msra.mxu0 %v175_v9  ;;  %390 = vmatprep.mubr.msk.bf16.mxu1 %vm406_vm0, %v405_v1 }
   0xc   :  { %387 = vmatpush3.bf16.msra.mxu1 %v398_v11 }
   0xd   :  { %388 = vmatprep.subr.bf16.mxu1 %v405_v1 }
  0x10   :  { %389 = vmatpush3.bf16.msra.mxu1 %v399_v12 }
  0x13   :  { %391 = vmatmul.mubr.msk.bf16.vlgmr.msra.gmra.mrb[4].mxu1 %vm34_vm5, %v400_v13 }
  0xdd   :  { %v102_v15 = vpop.f32.mrb[0].mxu0  ;;  %v158_v25 = vpop.f32.mrb[0].mxu1 }
  0xde   :  { %v109_v17 = vadd.f32 %v102_v15, %v54_v14  ;;  %v373_v18 = vpop.f32.mrb[1].mxu0  ;;  %v165_v26 = vadd.f32 %v158_v25, %v114_v24  ;;  %v379_v27 = vpop.f32.mrb[1].mxu1 }
  0xdf   :  { %v105_v19 = vpop.f32.mrb[2].mxu0  ;;  %v161_v28 = vpop.f32.mrb[2].mxu1 }
  0xe0   :  { %112 = vst.msk [vmem:[#allocation2] sm:$0xff] %vm31_vm1, %v109_v17  ;;  %v110_v20 = vadd.f32 %v105_v19, %v55_v16  ;;  %v374_v21 = vpop.f32.mrb[3].mxu0  ;;  %v380_v30 = vpop.f32.mrb[3].mxu1  ;;  %v166_v31 = vadd.f32 %v161_v28, %v115_v29 }
  0xe1   :  { %168 = vst.msk [vmem:[#allocation3] sm:$0xff] %vm34_vm5, %v165_v26 }
  0xe2   :  { %113 = vst.msk [vmem:[#allocation2 + $0x8] sm:$0xff] %vm31_vm1, %v110_v20 }
  0xe3   :  { %169 = vst.msk [vmem:[#allocation3 + $0x8] sm:$0xff] %vm34_vm5, %v166_v31 }
  0xe6   :  { %v326_v32 = vpop.f32.mrb[4].mxu1 }
  0xe7   :  { %v173_v22 = vld [vmem:[#allocation2] sm:$0xff]  ;;  %v392_v33 = vpop.f32.mrb[5].mxu1  ;;  %v327_v47 = vadd.f32 %v354_v40, %v326_v32 }
  0xe8   :  { %383 = vmatprep.mubr.msk.f32.mxu0 %vm31_vm1, %v173_v22  ;;  %v329_v34 = vpop.f32.mrb[6].mxu1  ;;  %v333_v45 = vld [vmem:[#allocation3] sm:$0xff] }
  0xe9   :  { %v174_v23 = vld [vmem:[#allocation2 + $0x8] sm:$0xff]  ;;  %v393_v35 = vpop.f32.mrb[7].mxu1  ;;  %v330_v42 = vadd.f32 %v354_v40, %v329_v34 }
  0xea   :  { %384 = vmatmul.mubr.msk.f32.vlgmr.msra.gmra.mrb[4].mxu0 %vm31_vm1, %v174_v23  ;;  %v334_v41 = vld [vmem:[#allocation3 + $0x8] sm:$0xff] }
 0x1bd   :  { %v385_v36 = vpop.f32.mrb[4].mxu0 }
 0x1be   :  { %v254_v37 = vadd.f32 1e-16, %v385_v36  ;;  %v248_v38 = vpop.f32.mrb[5].mxu0 }
 0x1bf   :  { %v249_v39 = vadd.f32 1e-16, %v248_v38 }
 0x1c0   :  { %401 = vrcp.f32 %v254_v37 }
 0x1c1   :  { %403 = vrcp.f32 %v249_v39 }
 0x1ca   :  { %v402_v43 = vpop.eup %401 }
 0x1cb   :  { %v404_v44 = vpop.eup %403  ;;  %v336_v46 = vmul.f32 %v402_v43, %v334_v41 }
 0x1cc   :  { %v335_v48 = vmul.f32 %v404_v44, %v333_v45 }
 0x1cd   :  { %v338_v49 = vadd.f32 %v336_v46, %v330_v42 }
 0x1ce   :  { %v337_v50 = vadd.f32 %v335_v48, %v327_v47 }
 0x1cf   :  { %v340_v51 = vmax.f32 %v338_v49, 0.0 }
 0x1d0   :  { %v339_v52 = vmax.f32 %v337_v50, 0.0 }
 0x1d1   :  { %342 = vst.msk [vmem:[%s500_s7 + $0x8] sm:$0xff] %vm34_vm5, %v340_v51 }
 0x1d2   :  { %341 = vst.msk [vmem:[%s500_s7] sm:$0xff] %vm34_vm5, %v339_v52 }

// kernel: ingram_forward.19
= control target key start
LH: loop header
LB: loop body
LE: loop exit
PB: predicated region body
PF: predicated region fallthrough
CT: control target
= control target key end

     0   :  { %vm92_vm0 = vcmask 1043456   ;;  %v265_v0 = vmov 0.0   ;;  %vm266_vm1 = vmmov 0   ;;  %vm74_vm2 = vcmask 60416   ;;  %s408_s3 = inlined_call_operand.vmem [shape: bf16[8,32], index: 3, kind: input, shape index: {}]   ;;  %s409_s0 = inlined_call_operand.vmem [shape: f32[48,8], index: 0, kind: input, shape index: {}]   ;;  %s410_s1 = inlined_call_operand.vmem [shape: f32[48,8], index: 1, kind: input, shape index: {}]   ;;  %s411_s4 = inlined_call_operand.vmem [shape: bf16[48,8], index: 4, kind: output, shape index: {0}]   ;;  %s412_s2 = inlined_call_operand.vmem [shape: f32[48,32], index: 2, kind: input, shape index: {}]   ;;  %s413_s5 = inlined_call_operand.vmem [shape: bf16[48,32], index: 5, kind: output, shape index: {1}]  }
   0x1   :  { %249 = vmatprep.subr.bf16.mxu1 %v265_v0  ;;  %v81_v1 = vld [vmem:[%s408_s3] sm:$0xf]  ;;  %241 = vmatprep.mubr.msk.bf16.mxu1 %vm266_vm1, %v265_v0  ;;  %v22_v2 = vld [vmem:[%s409_s0 + $0x10] sm:$0xff]  ;;  %v23_v3 = vld [vmem:[%s409_s0 + $0x18] sm:$0xff]  ;;  %vm82_vm3 = vcmask 64512   ;;  %vm189_vm4 = vcmask 257024  }
   0x2   :  { %v94_v4 = vsel %vm92_vm0, %v81_v1, 0  ;;  %v28_v5 = vld [vmem:[%s410_s1 + $0x10] sm:$0xff]  ;;  %v29_v6 = vld [vmem:[%s410_s1 + $0x18] sm:$0xff]  ;;  %235 = vmatprep.subr.bf16.mxu0 %v265_v0  ;;  %237 = vmatprep.mubr.msk.bf16.mxu0 %vm266_vm1, %v265_v0  ;;  %v20_v7 = vld [vmem:[%s409_s0] sm:$0xff] }
   0x3   :  { %250 = vmatpush3.bf16.msra.mxu1 %v94_v4  ;;  %v34_v8 = vsub.f32 %v22_v2, %v28_v5  ;;  %v35_v9 = vsub.f32 %v23_v3, %v29_v6  ;;  %236 = vmatpush3.bf16.msra.mxu0 %v94_v4  ;;  %v21_v10 = vld [vmem:[%s409_s0 + $0x8] sm:$0xff]  ;;  %v26_v11 = vld [vmem:[%s410_s1] sm:$0xff]  ;;  %v155_v42 = vld [vmem:[%s412_s2 + $0x10] sm:$0xff] }
   0x4   :  { %v27_v12 = vld [vmem:[%s410_s1 + $0x8] sm:$0xff]  ;;  %v32_v13 = vsub.f32 %v20_v7, %v26_v11  ;;  %v24_v15 = vld [vmem:[%s409_s0 + $0x20] sm:$0xff]  ;;  %v156_v44 = vld [vmem:[%s412_s2 + $0x18] sm:$0xff] }
   0x5   :  { %v33_v14 = vsub.f32 %v21_v10, %v27_v12  ;;  %v25_v16 = vld [vmem:[%s409_s0 + $0x28] sm:$0xff]  ;;  %v30_v17 = vld [vmem:[%s410_s1 + $0x20] sm:$0xff]  ;;  %v42_v18 = vmul.f32 1.442695, %v34_v8  ;;  %v44_v19 = vmul.f32 1.442695, %v35_v9 }
   0x6   :  { %v31_v20 = vld [vmem:[%s410_s1 + $0x28] sm:$0xff]  ;;  %v36_v21 = vsub.f32 %v24_v15, %v30_v17  ;;  %v38_v22 = vmul.f32 1.442695, %v32_v13  ;;  %v153_v45 = vld [vmem:[%s412_s2] sm:$0xff] }
   0x7   :  { %v40_v23 = vmul.f32 1.442695, %v33_v14  ;;  %v37_v24 = vsub.f32 %v25_v16, %v31_v20  ;;  %253 = vpow2.f32 %v42_v18  ;;  %v154_v50 = vld [vmem:[%s412_s2 + $0x8] sm:$0xff]  ;;  %v157_v61 = vld [vmem:[%s412_s2 + $0x20] sm:$0xff] }
   0x8   :  { %v46_v25 = vmul.f32 1.442695, %v36_v21  ;;  %255 = vpow2.f32 %v44_v19 }
   0x9   :  { %v48_v26 = vmul.f32 1.442695, %v37_v24  ;;  %257 = vpow2.f32 %v38_v22 }
   0xa   :  { %259 = vpow2.f32 %v40_v23 }
   0xb   :  { %261 = vpow2.f32 %v46_v25 }
   0xc   :  { %263 = vpow2.f32 %v48_v26 }
  0x11   :  { %v254_v27 = vpop.eup %253 }
  0x12   :  { %v256_v28 = vpop.eup %255  ;;  %v221_v29 = vpack.c.bf16 %v254_v27, %v254_v27 }
  0x13   :  { %v258_v30 = vpop.eup %257  ;;  %v51_v31 = vpack.c.bf16 %v256_v28, %v254_v27  ;;  %v222_v32 = vpack.c.bf16 %v256_v28, %v256_v28 }
  0x14   :  { %v260_v33 = vpop.eup %259  ;;  %77 = vst.msk [vmem:[%s411_s4 + $0x8] sm:$0xf] %vm74_vm2, %v221_v29  ;;  %v219_v34 = vpack.c.bf16 %v258_v30, %v258_v30 }
  0x15   :  { %v262_v35 = vpop.eup %261  ;;  %78 = vst.msk [vmem:[%s411_s4 + $0xc] sm:$0xf] %vm74_vm2, %v222_v32  ;;  %242 = vmatmul.mubr.msk.bf16.vlgmr.msra.gmra.mrb[0].mxu1 %vm82_vm3, %v51_v31  ;;  %v50_v36 = vpack.c.bf16 %v260_v33, %v258_v30  ;;  %v220_v37 = vpack.c.bf16 %v260_v33, %v260_v33 }
  0x16   :  { %v264_v38 = vpop.eup %263  ;;  %75 = vst.msk [vmem:[%s411_s4] sm:$0xf] %vm74_vm2, %v219_v34  ;;  %245 = vmatprep.mubr.msk.bf16.mxu1 %vm266_vm1, %v265_v0  ;;  %v223_v39 = vpack.c.bf16 %v262_v35, %v262_v35  ;;  %v158_v0 = vld [vmem:[%s412_s2 + $0x28] sm:$0xff] }
  0x17   :  { %76 = vst.msk [vmem:[%s411_s4 + $0x4] sm:$0xf] %vm74_vm2, %v220_v37  ;;  %238 = vmatmul.mubr.msk.bf16.vlgmr.msra.gmra.mrb[0].mxu0 %vm82_vm3, %v50_v36  ;;  %v224_v40 = vpack.c.bf16 %v264_v38, %v264_v38  ;;  %v52_v41 = vpack.c.bf16 %v264_v38, %v262_v35 }
  0x18   :  { %79 = vst.msk [vmem:[%s411_s4 + $0x10] sm:$0xf] %vm74_vm2, %v223_v39 }
  0x19   :  { %80 = vst.msk [vmem:[%s411_s4 + $0x14] sm:$0xf] %vm74_vm2, %v224_v40 }
  0x1d   :  { %246 = vmatmul.mubr.msk.bf16.gmra.mrb[4].mxu1 %vm82_vm3, %v52_v41 }
  0xe8   :  { %v138_v43 = vpop.f32.mrb[0].mxu1 }
  0xe9   :  { %v161_v46 = vmul.f32 %v155_v42, %v138_v43  ;;  %v243_v47 = vpop.f32.mrb[1].mxu1 }
  0xea   :  { %v141_v48 = vpop.f32.mrb[2].mxu1  ;;  %v130_v49 = vpop.f32.mrb[0].mxu0 }
  0xeb   :  { %v227_v51 = vpack.c.bf16 %v161_v46, %v161_v46  ;;  %v162_v52 = vmul.f32 %v156_v44, %v141_v48  ;;  %v244_v53 = vpop.f32.mrb[3].mxu1  ;;  %v159_v54 = vmul.f32 %v153_v45, %v130_v49  ;;  %v239_v55 = vpop.f32.mrb[1].mxu0 }
  0xec   :  { %v133_v56 = vpop.f32.mrb[2].mxu0 }
  0xed   :  { %192 = vst.msk [vmem:[%s413_s5 + $0x8] sm:$0xf] %vm189_vm4, %v227_v51  ;;  %v228_v57 = vpack.c.bf16 %v162_v52, %v162_v52  ;;  %v225_v58 = vpack.c.bf16 %v159_v54, %v159_v54  ;;  %v160_v59 = vmul.f32 %v154_v50, %v133_v56  ;;  %v240_v60 = vpop.f32.mrb[3].mxu0 }
  0xef   :  { %193 = vst.msk [vmem:[%s413_s5 + $0xc] sm:$0xf] %vm189_vm4, %v228_v57  ;;  %190 = vst.msk [vmem:[%s413_s5] sm:$0xf] %vm189_vm4, %v225_v58  ;;  %v226_v62 = vpack.c.bf16 %v160_v59, %v160_v59 }
  0xf0   :  { %v146_v63 = vpop.f32.mrb[4].mxu1 }
  0xf1   :  { %191 = vst.msk [vmem:[%s413_s5 + $0x4] sm:$0xf] %vm189_vm4, %v226_v62  ;;  %v163_v1 = vmul.f32 %v157_v61, %v146_v63  ;;  %v247_v2 = vpop.f32.mrb[5].mxu1 }
  0xf2   :  { %v149_v3 = vpop.f32.mrb[6].mxu1 }
  0xf3   :  { %v229_v4 = vpack.c.bf16 %v163_v1, %v163_v1  ;;  %v164_v5 = vmul.f32 %v158_v0, %v149_v3  ;;  %v248_v6 = vpop.f32.mrb[7].mxu1 }
  0xf5   :  { %194 = vst.msk [vmem:[%s413_s5 + $0x10] sm:$0xf] %vm189_vm4, %v229_v4  ;;  %v230_v7 = vpack.c.bf16 %v164_v5, %v164_v5 }
  0xf7   :  { %195 = vst.msk [vmem:[%s413_s5 + $0x14] sm:$0xf] %vm189_vm4, %v230_v7 }

// kernel: ingram_forward.18
= control target key start
LH: loop header
LB: loop body
LE: loop exit
PB: predicated region body
PF: predicated region fallthrough
CT: control target
= control target key end

     0   :  { %v521_v0 = vmov 0.0   ;;  %vm522_vm0 = vmmov 0   ;;  %vm102_vm1 = vcmask 785408   ;;  %vm206_vm4 = vcmask 261120   ;;  %s707_s1 = inlined_call_operand.vmem [shape: bf16[96,32], index: 1, kind: input, shape index: {}]   ;;  %s708_s0 = inlined_call_operand.vmem [shape: bf16[48,96], index: 0, kind: input, shape index: {}]   ;;  %s709_s3 = inlined_call_operand.vmem [shape: bf16[32,8], index: 3, kind: input, shape index: {}]   ;;  %s710_s4 = inlined_call_operand.vmem [shape: bf16[64,32], index: 4, kind: input, shape index: {}]   ;;  %s711_s2 = inlined_call_operand.vmem [shape: f32[1,32], index: 2, kind: input, shape index: {}]   ;;  %s712_s6 = inlined_call_operand.vmem [shape: f32[48,8], index: 6, kind: output, shape index: {0}]   ;;  %s713_s5 = inlined_call_operand.vmem [shape: f32[1,32], index: 5, kind: input, shape index: {}]   ;;  %s714_s7 = inlined_call_operand.vmem [shape: f32[48,32], index: 7, kind: output, shape index: {1}]  }
   0x1   :  { %444 = vmatprep.subr.bf16.mxu0 %v521_v0  ;;  %v506_v1 = vld [vmem:[%s707_s1] sm:$0xff]   ;;  %456 = vmatprep.mubr.msk.bf16.mxu0 %vm522_vm0, %v521_v0  ;;  %v507_v2 = vld [vmem:[%s707_s1 + $0x8] sm:$0xff]   ;;  %v508_v3 = vld [vmem:[%s707_s1 + $0x10] sm:$0xff]   ;;  %vm319_vm9 = vcmask 523264   ;;  %vm273_vm10 = vcmask 64512  }
   0x2   :  { %468 = vmatprep.subr.bf16.mxu1 %v521_v0  ;;  %472 = vmatprep.mubr.msk.bf16.mxu1 %vm522_vm0, %v521_v0  ;;  %v509_v4 = vld [vmem:[%s707_s1 + $0x18] sm:$0xff]   ;;  %v510_v5 = vld [vmem:[%s707_s1 + $0x20] sm:$0xff]   ;;  %v511_v6 = vld [vmem:[%s707_s1 + $0x28] sm:$0xff]  }
   0x3   :  { %445 = vmatpush3.bf16.msra.mxu0 %v506_v1  ;;  %v595_v7 = vld [vmem:[%s708_s0] sm:$0xff]   ;;  %v603_v8 = vld [vmem:[%s708_s0 + $0x8] sm:$0xff]   ;;  %v611_v9 = vld [vmem:[%s708_s0 + $0x10] sm:$0xff]  }
   0x4   :  { %446 = vmatprep.subr.bf16.mxu0 %v521_v0  ;;  %v515_v10 = vld [vmem:[%s709_s3] sm:$0xff]   ;;  %v516_v11 = vld [vmem:[%s709_s3 + $0x8] sm:$0xff]   ;;  %v519_v36 = vld [vmem:[%s710_s4 + $0x10] sm:$0xff]  }
   0x5   :  { %469 = vmatpush3.bf16.msra.mxu1 %v515_v10  ;;  %v397_v12 = vld [vmem:[%s711_s2] ss:$0 sm:$0xff]  ;;  %v518_v32 = vld [vmem:[%s710_s4 + $0x8] sm:$0xff]   ;;  %v520_v45 = vld [vmem:[%s710_s4 + $0x18] sm:$0xff]  }
   0x6   :  { %470 = vmatprep.subr.bf16.mxu1 %v521_v0  ;;  %v517_v23 = vld [vmem:[%s710_s4] sm:$0xff]  }
   0x7   :  { %447 = vmatpush3.bf16.msra.mxu0 %v507_v2  ;;  %v415_v62 = vld [vmem:[%s713_s5] ss:$0 sm:$0xff] }
   0x8   :  { %448 = vmatprep.subr.bf16.mxu0 %v521_v0 }
   0x9   :  { %471 = vmatpush3.bf16.msra.mxu1 %v516_v11 }
   0xa   :  { %484 = vmatprep.subr.bf16.mxu1 %v521_v0 }
   0xb   :  { %449 = vmatpush3.bf16.msra.mxu0 %v508_v3 }
   0xc   :  { %450 = vmatprep.subr.bf16.mxu0 %v521_v0 }
   0xf   :  { %451 = vmatpush3.bf16.msra.mxu0 %v509_v4 }
  0x10   :  { %452 = vmatprep.subr.bf16.mxu0 %v521_v0 }
  0x13   :  { %453 = vmatpush3.bf16.msra.mxu0 %v510_v5 }
  0x14   :  { %454 = vmatprep.subr.bf16.mxu0 %v521_v0 }
  0x17   :  { %455 = vmatpush3.bf16.msra.mxu0 %v511_v6 }
  0x1a   :  { %457 = vmatmul.mubr.msk.bf16.vlgmr.msra.gmra.mrb[0].mxu0 %vm102_vm1, %v595_v7 }
  0x1b   :  { %460 = vmatprep.mubr.msk.bf16.mxu0 %vm522_vm0, %v521_v0 }
  0x22   :  { %461 = vmatmul.mubr.msk.bf16.gmra.mrb[4].mxu0 %vm102_vm1, %v603_v8 }
  0x23   :  { %464 = vmatprep.mubr.msk.bf16.mxu0 %vm522_vm0, %v521_v0 }
  0x2a   :  { %465 = vmatmul.mubr.msk.bf16.gmra.mrb[8].mxu0 %vm102_vm1, %v611_v9 }
  0xed   :  { %v146_v13 = vpop.f32.mrb[0].mxu0 }
  0xee   :  { %v147_v14 = vadd.f32 %v397_v12, %v146_v13  ;;  %v458_v15 = vpop.f32.mrb[1].mxu0 }
  0xef   :  { %v149_v16 = vpop.f32.mrb[2].mxu0 }
  0xf0   :  { %v175_v17 = vmul.f32 0.2, %v147_v14  ;;  %v150_v18 = vadd.f32 %v397_v12, %v149_v16  ;;  %v459_v19 = vpop.f32.mrb[3].mxu0  ;;  %vm169_vm2 = vcmp.gt.f32.partialorder %v147_v14, 0.0 }
  0xf2   :  { %vm170_vm3 = vcmp.gt.f32.partialorder %v150_v18, 0.0  ;;  %v176_v20 = vmul.f32 0.2, %v150_v18  ;;  %v181_v21 = vsel %vm169_vm2, %v147_v14, %v175_v17 }
  0xf4   :  { %v182_v22 = vsel %vm170_vm3, %v150_v18, %v176_v20 }
  0xf5   :  { %v187_v24 = vpack.c.bf16 %v182_v22, %v181_v21  ;;  %v154_v25 = vpop.f32.mrb[4].mxu0 }
  0xf6   :  { %v155_v26 = vadd.f32 %v397_v12, %v154_v25  ;;  %v462_v27 = vpop.f32.mrb[5].mxu0 }
  0xf7   :  { %v157_v28 = vpop.f32.mrb[6].mxu0  ;;  %473 = vmatmul.mubr.msk.bf16.vlgmr.msra.gmra.mrb[0].mxu1 %vm206_vm4, %v187_v24 }
  0xf8   :  { %v177_v29 = vmul.f32 0.2, %v155_v26  ;;  %v158_v30 = vadd.f32 %v397_v12, %v157_v28  ;;  %485 = vmatpush3.bf16.msra.mxu1 %v517_v23  ;;  %v463_v31 = vpop.f32.mrb[7].mxu0  ;;  %476 = vmatprep.mubr.msk.bf16.mxu1 %vm522_vm0, %v521_v0  ;;  %vm171_vm5 = vcmp.gt.f32.partialorder %v155_v26, 0.0 }
  0xf9   :  { %486 = vmatprep.subr.bf16.mxu1 %v521_v0 }
  0xfa   :  { %vm172_vm6 = vcmp.gt.f32.partialorder %v158_v30, 0.0  ;;  %v178_v33 = vmul.f32 0.2, %v158_v30  ;;  %v183_v34 = vsel %vm171_vm5, %v155_v26, %v177_v29 }
  0xfc   :  { %v184_v35 = vsel %vm172_vm6, %v158_v30, %v178_v33  ;;  %487 = vmatpush3.bf16.msra.mxu1 %v518_v32 }
  0xfd   :  { %v188_v37 = vpack.c.bf16 %v184_v35, %v183_v34  ;;  %v162_v38 = vpop.f32.mrb[8].mxu0  ;;  %488 = vmatprep.subr.bf16.mxu1 %v521_v0 }
  0xfe   :  { %v163_v39 = vadd.f32 %v397_v12, %v162_v38  ;;  %v466_v40 = vpop.f32.mrb[9].mxu0 }
  0xff   :  { %v165_v41 = vpop.f32.mrb[10].mxu0  ;;  %477 = vmatmul.mubr.msk.bf16.gmra.mrb[4].mxu1 %vm206_vm4, %v188_v37 }
 0x100   :  { %v179_v42 = vmul.f32 0.2, %v163_v39  ;;  %v166_v43 = vadd.f32 %v397_v12, %v165_v41  ;;  %v467_v44 = vpop.f32.mrb[11].mxu0  ;;  %489 = vmatpush3.bf16.msra.mxu1 %v519_v36  ;;  %480 = vmatprep.mubr.msk.bf16.mxu1 %vm522_vm0, %v521_v0  ;;  %vm173_vm7 = vcmp.gt.f32.partialorder %v163_v39, 0.0 }
 0x101   :  { %490 = vmatprep.subr.bf16.mxu1 %v521_v0 }
 0x102   :  { %vm174_vm8 = vcmp.gt.f32.partialorder %v166_v43, 0.0  ;;  %v180_v46 = vmul.f32 0.2, %v166_v43  ;;  %v185_v47 = vsel %vm173_vm7, %v163_v39, %v179_v42 }
 0x104   :  { %v186_v48 = vsel %vm174_vm8, %v166_v43, %v180_v46  ;;  %491 = vmatpush3.bf16.msra.mxu1 %v520_v45 }
 0x105   :  { %v189_v49 = vpack.c.bf16 %v186_v48, %v185_v47 }
 0x107   :  { %481 = vmatmul.mubr.msk.bf16.gmra.mrb[8].mxu1 %vm206_vm4, %v189_v49 }
 0x108   :  { %492 = vmatprep.mubr.msk.bf16.mxu1 %vm522_vm0, %v521_v0 }
 0x10f   :  { %493 = vmatmul.mubr.msk.bf16.vlgmr.msra.gmra.mrb[12].mxu1 %vm319_vm9, %v595_v7 }
 0x110   :  { %496 = vmatprep.mubr.msk.bf16.mxu1 %vm522_vm0, %v521_v0 }
 0x117   :  { %497 = vmatmul.mubr.msk.bf16.gmra.mrb[16].mxu1 %vm319_vm9, %v603_v8 }
 0x118   :  { %500 = vmatprep.mubr.msk.bf16.mxu1 %vm522_vm0, %v521_v0 }
 0x11f   :  { %501 = vmatmul.mubr.msk.bf16.gmra.mrb[20].mxu1 %vm319_vm9, %v611_v9 }
 0x1ca   :  { %v250_v50 = vpop.f32.mrb[0].mxu1 }
 0x1cb   :  { %274 = vst.msk [vmem:[%s712_s6] sm:$0xff] %vm273_vm10, %v250_v50  ;;  %v474_v51 = vpop.f32.mrb[1].mxu1 }
 0x1cc   :  { %v253_v52 = vpop.f32.mrb[2].mxu1 }
 0x1cd   :  { %275 = vst.msk [vmem:[%s712_s6 + $0x8] sm:$0xff] %vm273_vm10, %v253_v52  ;;  %v475_v53 = vpop.f32.mrb[3].mxu1 }
 0x1d2   :  { %v258_v54 = vpop.f32.mrb[4].mxu1 }
 0x1d3   :  { %276 = vst.msk [vmem:[%s712_s6 + $0x10] sm:$0xff] %vm273_vm10, %v258_v54  ;;  %v478_v55 = vpop.f32.mrb[5].mxu1 }
 0x1d4   :  { %v261_v56 = vpop.f32.mrb[6].mxu1 }
 0x1d5   :  { %277 = vst.msk [vmem:[%s712_s6 + $0x18] sm:$0xff] %vm273_vm10, %v261_v56  ;;  %v479_v57 = vpop.f32.mrb[7].mxu1 }
 0x1da   :  { %v266_v58 = vpop.f32.mrb[8].mxu1 }
 0x1db   :  { %278 = vst.msk [vmem:[%s712_s6 + $0x20] sm:$0xff] %vm273_vm10, %v266_v58  ;;  %v482_v59 = vpop.f32.mrb[9].mxu1 }
 0x1dc   :  { %v269_v60 = vpop.f32.mrb[10].mxu1 }
 0x1dd   :  { %279 = vst.msk [vmem:[%s712_s6 + $0x28] sm:$0xff] %vm273_vm10, %v269_v60  ;;  %v483_v61 = vpop.f32.mrb[11].mxu1 }
 0x1e2   :  { %v360_v63 = vpop.f32.mrb[12].mxu1 }
 0x1e3   :  { %v361_v0 = vadd.f32 %v415_v62, %v360_v63  ;;  %v494_v1 = vpop.f32.mrb[13].mxu1 }
 0x1e4   :  { %v363_v2 = vpop.f32.mrb[14].mxu1 }
 0x1e5   :  { %383 = vst.msk [vmem:[%s714_s7] sm:$0xff] %vm206_vm4, %v361_v0  ;;  %v364_v3 = vadd.f32 %v415_v62, %v363_v2  ;;  %v495_v4 = vpop.f32.mrb[15].mxu1 }
 0x1e7   :  { %384 = vst.msk [vmem:[%s714_s7 + $0x8] sm:$0xff] %vm206_vm4, %v364_v3 }
 0x1ea   :  { %v368_v5 = vpop.f32.mrb[16].mxu1 }
 0x1eb   :  { %v369_v6 = vadd.f32 %v415_v62, %v368_v5  ;;  %v498_v7 = vpop.f32.mrb[17].mxu1 }
 0x1ec   :  { %v371_v8 = vpop.f32.mrb[18].mxu1 }
 0x1ed   :  { %385 = vst.msk [vmem:[%s714_s7 + $0x10] sm:$0xff] %vm206_vm4, %v369_v6  ;;  %v372_v9 = vadd.f32 %v415_v62, %v371_v8  ;;  %v499_v10 = vpop.f32.mrb[19].mxu1 }
 0x1ef   :  { %386 = vst.msk [vmem:[%s714_s7 + $0x18] sm:$0xff] %vm206_vm4, %v372_v9 }
 0x1f2   :  { %v376_v11 = vpop.f32.mrb[20].mxu1 }
 0x1f3   :  { %v377_v12 = vadd.f32 %v415_v62, %v376_v11  ;;  %v502_v13 = vpop.f32.mrb[21].mxu1 }
 0x1f4   :  { %v379_v14 = vpop.f32.mrb[22].mxu1 }
 0x1f5   :  { %387 = vst.msk [vmem:[%s714_s7 + $0x20] sm:$0xff] %vm206_vm4, %v377_v12  ;;  %v380_v15 = vadd.f32 %v415_v62, %v379_v14  ;;  %v503_v16 = vpop.f32.mrb[23].mxu1 }
 0x1f7   :  { %388 = vst.msk [vmem:[%s714_s7 + $0x28] sm:$0xff] %vm206_vm4, %v380_v15 }

// kernel: ingram_forward.20
= control target key start
LH: loop header
LB: loop body
LE: loop exit
PB: predicated region body
PF: predicated region fallthrough
CT: control target
= control target key end

     0   :  { %v38_v0 = vlaneseq  ;;  %v457_v1 = vmov 0.0   ;;  %vm458_vm0 = vmmov 0   ;;  %vm31_vm1 = vcmask 64512   ;;  %s559_s1 = inlined_call_operand.vmem [shape: bf16[48,8], index: 1, kind: input, shape index: {}]   ;;  %s560_s0 = inlined_call_operand.vmem [shape: s32[1,48], index: 0, kind: input, shape index: {}]   ;;  %s561_s2 = inlined_call_operand.vmem [shape: bf16[48,32], index: 2, kind: input, shape index: {}]   ;;  %s562_s6 = inlined_call_operand.vmem [shape: f32[8,32], index: 6, kind: input, shape index: {}]   ;;  %s563_s4 = inlined_call_operand.vmem [shape: bf16[32,32], index: 4, kind: input, shape index: {}]   ;;  %s564_s3 = inlined_call_operand.vmem [shape: bf16[16,32], index: 3, kind: input, shape index: {}]   ;;  %s565_s5 = inlined_call_operand.vmem [shape: f32[1,32], index: 5, kind: input, shape index: {}]   ;;  %s566_s7 = inlined_call_operand.vmem [shape: f32[16,32], index: 7, kind: output, shape index: {}]  }
   0x1   :  { %409 = vmatprep.subr.bf16.mxu0 %v457_v1  ;;  %v444_v2 = vld [vmem:[%s559_s1] sm:$0xff]   ;;  %415 = vmatprep.mubr.msk.bf16.mxu0 %vm458_vm0, %v457_v1  ;;  %32 = vst.msk [vmem:[#allocation2] sm:$0xff] %vm31_vm1, %v457_v1  ;;  %33 = vst.msk [vmem:[#allocation2 + $0x8] sm:$0xff] %vm31_vm1, %v457_v1  ;;  %v445_v4 = vld [vmem:[%s559_s1 + $0x8] sm:$0xff]   ;;  %vm80_vm4 = vcmask 392192   ;;  %vm34_vm5 = vcmask 261120  }
   0x2   :  { %v39_v3 = vshrl.u32 %v38_v0, 7  ;;  %419 = vmatprep.subr.bf16.mxu1 %v457_v1  ;;  %425 = vmatprep.mubr.msk.bf16.mxu1 %vm458_vm0, %v457_v1  ;;  %v379_v6 = vld [vmem:[%s560_s0] ss:$0 sm:$0xff]  ;;  %v446_v7 = vld [vmem:[%s559_s1 + $0x10] sm:$0xff]   ;;  %v448_v12 = vld [vmem:[%s561_s2 + $0x8] sm:$0xff]   ;;  %35 = vst.msk [vmem:[#allocation3] sm:$0xff] %vm34_vm5, %v457_v1 }
   0x3   :  { %410 = vmatpush3.bf16.msra.mxu0 %v444_v2  ;;  %v447_v11 = vld [vmem:[%s561_s2] sm:$0xff]   ;;  %v449_v13 = vld [vmem:[%s561_s2 + $0x10] sm:$0xff]   ;;  %36 = vst.msk [vmem:[#allocation3 + $0x8] sm:$0xff] %vm34_vm5, %v457_v1  ;;  %v451_v16 = vld [vmem:[%s563_s4 + $0x8] sm:$0xff]  }
   0x4   :  { %411 = vmatprep.subr.bf16.mxu0 %v457_v1  ;;  %v40_v5 = vadd.s32 8, %v39_v3  ;;  %vm49_vm2 = vcmp.eq.s32.totalorder %v379_v6, %v39_v3  ;;  %420 = vmatpush3.bf16.msra.mxu1 %v447_v11  ;;  %v207_v14 = vld [vmem:[%s562_s6] sm:$0xff] }
   0x5   :  { %v51_v8 = vsel %vm49_vm2, 1.0, %v457_v1  ;;  %421 = vmatprep.subr.bf16.mxu1 %v457_v1  ;;  %v450_v15 = vld [vmem:[%s563_s4] sm:$0xff]  }
   0x6   :  { %vm50_vm3 = vcmp.eq.s32.totalorder %v379_v6, %v40_v5  ;;  %v452_v17 = vld [vmem:[%s564_s3] sm:$0xff]  }
   0x7   :  { %412 = vmatpush3.bf16.msra.mxu0 %v445_v4  ;;  %v52_v9 = vsel %vm50_vm3, 1.0, %v457_v1  ;;  %v390_v44 = vld [vmem:[%s565_s5] ss:$0 sm:$0xff] }
   0x8   :  { %413 = vmatprep.subr.bf16.mxu0 %v457_v1  ;;  %v53_v10 = vpack.c.bf16 %v52_v9, %v51_v8  ;;  %422 = vmatpush3.bf16.msra.mxu1 %v448_v12  ;;  %v54_v18 = vld [vmem:[#allocation2] sm:$0xff]  ;;  %v55_v20 = vld [vmem:[#allocation2 + $0x8] sm:$0xff] }
   0x9   :  { %423 = vmatprep.subr.bf16.mxu1 %v457_v1  ;;  %v130_v28 = vld [vmem:[#allocation3] sm:$0xff] }
   0xa   :  { %v131_v33 = vld [vmem:[#allocation3 + $0x8] sm:$0xff] }
   0xb   :  { %414 = vmatpush3.bf16.msra.mxu0 %v446_v7 }
   0xc   :  { %429 = vmatprep.subr.mxu0 %v207_v14  ;;  %424 = vmatpush3.bf16.msra.mxu1 %v449_v13 }
   0xd   :  { %434 = vmatprep.subr.bf16.mxu1 %v457_v1 }
   0xe   :  { %416 = vmatmul.mubr.msk.bf16.vlgmr.msra.gmra.mrb[0].mxu0 %vm80_vm4, %v53_v10 }
   0xf   :  { %430 = vmatpush3.msra.mxu0 %v207_v14  ;;  %426 = vmatmul.mubr.msk.bf16.vlgmr.msra.gmra.mrb[0].mxu1 %vm80_vm4, %v53_v10 }
  0x10   :  { %438 = vmatprep.mubr.msk.bf16.mxu1 %vm458_vm0, %v457_v1  ;;  %435 = vmatpush3.bf16.msra.mxu1 %v450_v15 }
  0x11   :  { %436 = vmatprep.subr.bf16.mxu1 %v457_v1 }
  0x14   :  { %437 = vmatpush3.bf16.msra.mxu1 %v451_v16 }
  0x17   :  { %439 = vmatmul.mubr.msk.bf16.vlgmr.msra.gmra.mrb[4].mxu1 %vm34_vm5, %v452_v17 }
  0xe1   :  { %v118_v19 = vpop.f32.mrb[0].mxu0 }
  0xe2   :  { %v125_v21 = vadd.f32 %v118_v19, %v54_v18  ;;  %v417_v22 = vpop.f32.mrb[1].mxu0  ;;  %v190_v29 = vpop.f32.mrb[0].mxu1 }
  0xe3   :  { %v121_v23 = vpop.f32.mrb[2].mxu0  ;;  %v197_v30 = vadd.f32 %v190_v29, %v130_v28  ;;  %v427_v31 = vpop.f32.mrb[1].mxu1 }
  0xe4   :  { %128 = vst.msk [vmem:[#allocation2] sm:$0xff] %vm31_vm1, %v125_v21  ;;  %v126_v24 = vadd.f32 %v121_v23, %v55_v20  ;;  %v418_v25 = vpop.f32.mrb[3].mxu0  ;;  %v193_v32 = vpop.f32.mrb[2].mxu1 }
  0xe5   :  { %200 = vst.msk [vmem:[#allocation3] sm:$0xff] %vm34_vm5, %v197_v30  ;;  %v428_v34 = vpop.f32.mrb[3].mxu1  ;;  %v198_v35 = vadd.f32 %v193_v32, %v131_v33 }
  0xe6   :  { %129 = vst.msk [vmem:[#allocation2 + $0x8] sm:$0xff] %vm31_vm1, %v126_v24 }
  0xe7   :  { %201 = vst.msk [vmem:[#allocation3 + $0x8] sm:$0xff] %vm34_vm5, %v198_v35 }
  0xea   :  { %v358_v36 = vpop.f32.mrb[4].mxu1 }
  0xeb   :  { %v205_v26 = vld [vmem:[#allocation2] sm:$0xff]  ;;  %v440_v37 = vpop.f32.mrb[5].mxu1  ;;  %v359_v51 = vadd.f32 %v390_v44, %v358_v36 }
  0xec   :  { %431 = vmatprep.mubr.msk.f32.mxu0 %vm31_vm1, %v205_v26  ;;  %v361_v38 = vpop.f32.mrb[6].mxu1  ;;  %v365_v49 = vld [vmem:[#allocation3] sm:$0xff] }
  0xed   :  { %v206_v27 = vld [vmem:[#allocation2 + $0x8] sm:$0xff]  ;;  %v441_v39 = vpop.f32.mrb[7].mxu1  ;;  %v362_v46 = vadd.f32 %v390_v44, %v361_v38 }
  0xee   :  { %432 = vmatmul.mubr.msk.f32.vlgmr.msra.gmra.mrb[4].mxu0 %vm31_vm1, %v206_v27  ;;  %v366_v45 = vld [vmem:[#allocation3 + $0x8] sm:$0xff] }
 0x1c1   :  { %v433_v40 = vpop.f32.mrb[4].mxu0 }
 0x1c2   :  { %v286_v41 = vadd.f32 1e-16, %v433_v40  ;;  %v280_v42 = vpop.f32.mrb[5].mxu0 }
 0x1c3   :  { %v281_v43 = vadd.f32 1e-16, %v280_v42 }
 0x1c4   :  { %453 = vrcp.f32 %v286_v41 }
 0x1c5   :  { %455 = vrcp.f32 %v281_v43 }
 0x1ce   :  { %v454_v47 = vpop.eup %453 }
 0x1cf   :  { %v456_v48 = vpop.eup %455  ;;  %v368_v50 = vmul.f32 %v454_v47, %v366_v45 }
 0x1d0   :  { %v367_v52 = vmul.f32 %v456_v48, %v365_v49 }
 0x1d1   :  { %v370_v53 = vadd.f32 %v368_v50, %v362_v46 }
 0x1d2   :  { %v369_v54 = vadd.f32 %v367_v52, %v359_v51 }
 0x1d3   :  { %v372_v55 = vmax.f32 %v370_v53, 0.0 }
 0x1d4   :  { %v371_v56 = vmax.f32 %v369_v54, 0.0 }
 0x1d5   :  { %374 = vst.msk [vmem:[%s566_s7 + $0x8] sm:$0xff] %vm34_vm5, %v372_v55 }
 0x1d6   :  { %373 = vst.msk [vmem:[%s566_s7] sm:$0xff] %vm34_vm5, %v371_v56 }

</bundles_post_ra>
